<compile_context>
chip_gen: v7x
topology: tpu7x:2x2x1
jax: 0.10.0
libtpu: 0.0.40
codegen_flags: <defaults>
</compile_context>

<pallas_src>
import numpy as np
import jax
import jax.numpy as jnp
from jax.experimental import pallas as pl
from jax.experimental.pallas import tpu as pltpu

EPS = 1e-5  # PyTorch BatchNorm1d default eps

CURRENT_DIM = 2
SPEED_DIM = 1
PM_TEMP_DIM = 1
PM_MATERIAL_DIM = 6
PARAMS_DIM = CURRENT_DIM + SPEED_DIM + PM_TEMP_DIM          # 4  (the `parameters` input)
HIDDEN_DIM_INIT = 6
NUM_FTRS = 1000                                             # backbone feature width
NUM_FTRS_PAD = 1024                                         # padded to a lane multiple
CONCAT_DIM = HIDDEN_DIM_INIT + PARAMS_DIM + PM_MATERIAL_DIM # 16

BRANCH_DIMS = ((25, 25, 50), (35, 35, 50), (35, 35, 50))    # hidden dims per branch

# Lane widths, sized to the real feature counts (all 128 multiples -> lane dense).
H_W    = 128   # h / concat lanes: 6 real h cols, pp (10 cols) injected at lane offset 6
BR01_W = 128   # fused branch level-0/1 outputs: 25+35+35 = 95 real cols
BR2_W  = 256   # fused branch level-2 outputs: 50+50+50 = 150 real cols
OUT_W  = 128   # fused out1/out2/out3: 3 real cols
PACK_W = 256   # lane width of the single packed bf16 parameter buffer

# ------------------------------------------------------------------ packed-buffer layout
# bf16 buffer -> all row offsets are multiples of 16 (bf16 sublane packing).
OFF_W1   = 0                          # (1024, :128) linear1 (+bn1, +backbone bias folded)
OFF_B1   = OFF_W1 + NUM_FTRS_PAD      # bias row
OFF_W0   = OFF_B1 + 16                # (128, :128) merged level-0 weight (rows 0..15 real)
OFF_B0   = OFF_W0 + H_W
OFF_W1BD = OFF_B0 + 16                # (128, :128) level-1 block-diagonal
OFF_B1BD = OFF_W1BD + BR01_W
OFF_W2BD = OFF_B1BD + 16              # (128, 256)  level-2 block-diagonal (150 real cols)
OFF_B2BD = OFF_W2BD + BR01_W
OFF_WO   = OFF_B2BD + 16              # (256, :128) fused output heads (cols 0..2 real)
OFF_BO   = OFF_WO + BR2_W
PACK_ROWS = OFF_BO + 16               # 1744


# ----------------------------------------------------------------------------- kernel
def _kernel(img_ref, pp_ref, wb_ref, p_ref, out_ref):
    def mm(a, b):
        return jnp.dot(a, b, preferred_element_type=jnp.float32)

    # Synthetic swin_t backbone: bf16 MXU operands, f32 accumulate. The f32 image tile is
    # cast in-kernel (VPU convert hides under weight DMA / MXU work).
    feat = mm(img_ref[...].astype(jnp.bfloat16), wb_ref[...])                 # (TB, 1024) f32

    # linear1 + bn1 (folded host-side) + ReLU; only 6 real cols -> 128 lanes.
    h = jnp.maximum(
        mm(feat.astype(jnp.bfloat16), p_ref[OFF_W1:OFF_W1 + NUM_FTRS_PAD, :H_W])
        + p_ref[OFF_B1:OFF_B1 + 1, :H_W], 0.0)                                # (TB, 128)

    # concat([h, parameters, pm_material]) realized as one add: pp arrives pre-placed at
    # lanes 6..15 and h lanes 6..127 are structurally zero (W1/bias cols 6.. are zero).
    x = h + pp_ref[...]

    # Branch level 0: three branches fused column-wise; merged h/pp weight, single dot.
    x = jnp.maximum(
        mm(x.astype(jnp.bfloat16), p_ref[OFF_W0:OFF_W0 + H_W, :BR01_W])
        + p_ref[OFF_B0:OFF_B0 + 1, :BR01_W], 0.0)

    # Branch level 1: block-diagonal fused weights (95 real cols in 128 lanes).
    x = jnp.maximum(
        mm(x.astype(jnp.bfloat16), p_ref[OFF_W1BD:OFF_W1BD + BR01_W, :BR01_W])
        + p_ref[OFF_B1BD:OFF_B1BD + 1, :BR01_W], 0.0)

    # Branch level 2: block-diagonal, widens to 150 real cols in 256 lanes.
    x = jnp.maximum(
        mm(x.astype(jnp.bfloat16), p_ref[OFF_W2BD:OFF_W2BD + BR01_W, :])
        + p_ref[OFF_B2BD:OFF_B2BD + 1, :], 0.0)

    # Fused out1/out2/out3: lane-dense (TB, 128) store; columns 0..2 hold y1..y3.
    out_ref[...] = (mm(x.astype(jnp.bfloat16), p_ref[OFF_WO:OFF_WO + BR2_W, :OUT_W])
                    + p_ref[OFF_BO:OFF_BO + 1, :OUT_W]).astype(out_ref.dtype)


# ------------------------------------------------------------------- parameter builders
def init_params(key, img_feat_dim):
    """PyTorch-like per-layer parameters (Linear weights/biases + BN running stats)."""
    keys = iter(jax.random.split(key, 128))

    def linear(din, dout, scale=0.05):
        W = scale * jax.random.normal(next(keys), (din, dout), jnp.float32)
        b = scale * jax.random.normal(next(keys), (dout,), jnp.float32)
        return W, b

    def bn(d):
        g = 1.0 + 0.1 * jax.random.normal(next(keys), (d,), jnp.float32)
        be = 0.1 * jax.random.normal(next(keys), (d,), jnp.float32)
        mu = 0.1 * jax.random.normal(next(keys), (d,), jnp.float32)
        var = jax.random.uniform(next(keys), (d,), jnp.float32, minval=0.5, maxval=1.5)
        return (g, be, mu, var)

    P = {}
    P["Wb"], P["bb"] = linear(img_feat_dim, NUM_FTRS)          # synthetic backbone
    P["W1"], P["b1"] = linear(NUM_FTRS, HIDDEN_DIM_INIT)       # linear1
    P["bn1"] = bn(HIDDEN_DIM_INIT)                             # bn1
    P["branches"] = []
    for dims in BRANCH_DIMS:
        layers = []
        din = CONCAT_DIM
        for d in dims:
            W, b = linear(din, d)
            layers.append((W, b, bn(d)))
            din = d
        Wo, bo = linear(din, 1)
        P["branches"].append({"hidden": layers, "Wo": Wo, "bo": bo})
    return P


def _fold_bn(W, b, bn_params):
    """Fold eval-mode BatchNorm into the preceding Linear (exact up to reassociation)."""
    g, be, mu, var = (np.asarray(t, np.float32) for t in bn_params)
    s = g / np.sqrt(var + EPS)
    return (np.asarray(W, np.float32) * s[None, :],
            (np.asarray(b, np.float32) - mu) * s + be)


def _round_up(x, m):
    return ((x + m - 1) // m) * m


def pack_params(P, img_feat_dim):
    """Build the two kernel inputs: bf16 backbone weight + one packed bf16 param buffer."""
    k_pad = max(128, _round_up(img_feat_dim, 128))

    # Backbone weight, zero-padded (K -> k_pad rows, 1000 -> 1024 cols), stored bf16.
    wb = np.zeros((k_pad, NUM_FTRS_PAD), np.float32)
    wb[:img_feat_dim, :NUM_FTRS] = np.asarray(P["Wb"], np.float32)
    wb_bf16 = jnp.asarray(wb, dtype=jnp.bfloat16)

    buf = np.zeros((PACK_ROWS, PACK_W), np.float32)

    # linear1 + bn1 folded; backbone bias bb folded into the bias row.
    W1f, b1f = _fold_bn(P["W1"], P["b1"], P["bn1"])            # (1000, 6), (6,)
    buf[OFF_W1:OFF_W1 + NUM_FTRS, :HIDDEN_DIM_INIT] = W1f
    buf[OFF_B1, :HIDDEN_DIM_INIT] = np.asarray(P["bb"], np.float32) @ W1f + b1f

    # Column layout of the fused branch activations.
    widths0 = [d[0] for d in BRANCH_DIMS]                      # 25, 35, 35
    off0 = np.cumsum([0] + widths0)                            # 0, 25, 60, 95
    widths2 = [d[2] for d in BRANCH_DIMS]                      # 50, 50, 50
    off2 = np.cumsum([0] + widths2)                            # 0, 50, 100, 150

    for bi, br in enumerate(P["branches"]):
        (Wa, ba, bna), (Wm, bm, bnm), (Wz, bz, bnz) = br["hidden"]
        c0, c1 = int(off0[bi]), int(off0[bi + 1])
        # level 0: consumes concat([h(6), parameters(4), pm_material(6)]) = rows 0..15 of
        # the merged (128 -> 128) weight (the pp rows sit at 6..15, matching the lane add).
        W0f, b0f = _fold_bn(Wa, ba, bna)                       # (16, d0)
        buf[OFF_W0:OFF_W0 + CONCAT_DIM, c0:c1] = W0f
        buf[OFF_B0, c0:c1] = b0f
        # level 1: block-diagonal (d0 -> d1, square here)
        W1b, b1b = _fold_bn(Wm, bm, bnm)
        buf[OFF_W1BD + c0:OFF_W1BD + c1, c0:c1] = W1b
        buf[OFF_B1BD, c0:c1] = b1b
        # level 2: block-diagonal (d1 -> 50), output in 256 lanes
        W2b, b2b = _fold_bn(Wz, bz, bnz)
        d0c, d1c = int(off2[bi]), int(off2[bi + 1])
        buf[OFF_W2BD + c0:OFF_W2BD + c1, d0c:d1c] = W2b
        buf[OFF_B2BD, d0c:d1c] = b2b
        # output head: column bi of the fused output
        buf[OFF_WO + d0c:OFF_WO + d1c, bi] = np.asarray(br["Wo"], np.float32)[:, 0]
        buf[OFF_BO, bi] = float(np.asarray(br["bo"], np.float32)[0])

    return wb_bf16, jnp.asarray(buf, dtype=jnp.bfloat16)


# ------------------------------------------------------------------------------ wrapper
def _batch_tile_cap():
    """Generation-aware batch tile: 128 on v5e (4x128^2 MXU), 256 on v6e/v7x (2x256^2)."""
    try:
        kind = jax.devices()[0].device_kind.lower()
    except Exception:
        return 128
    if "v5 lite" in kind or "v5e" in kind or "v5litepod" in kind:
        return 128
    return 256


def regression_iron_loss_forward(image, parameters, pm_material, wb_bf16, pbuf):
    B = image.shape[0]
    k_real = image.shape[1] * image.shape[2] * image.shape[3]
    k_pad = wb_bf16.shape[0]

    # NCHW row-major flatten (== torch.flatten); stays f32 (cast to bf16 in-kernel).
    img = image.reshape(B, -1).astype(jnp.float32)
    if k_pad != k_real:                                   # only if K is not lane-aligned
        img = jnp.pad(img, ((0, 0), (0, k_pad - k_real)))

    # [parameters, pm_material] pre-placed at lane offset 6 of the h vector (cols 6..15).
    pp = jnp.concatenate([parameters, pm_material], axis=1).astype(jnp.float32)
    pp = jnp.pad(pp, ((0, 0), (HIDDEN_DIM_INIT, H_W - HIDDEN_DIM_INIT - pp.shape[1])))

    # Fixed batch tile, batch padded to a tile multiple, grid via pl.cdiv.
    tb_cap = _batch_tile_cap()
    b8 = max(8, _round_up(B, 8))
    tb = min(tb_cap, b8)
    if b8 == tb and b8 >= 128:
        tb = _round_up(b8 // 2, 8)     # >= 2 tiles so v7x megacore shards across both TCs
    b_pad = _round_up(b8, tb)
    grid = (pl.cdiv(b_pad, tb),)

    if b_pad != B:
        img = jnp.pad(img, ((0, b_pad - B), (0, 0)))
        pp = jnp.pad(pp, ((0, b_pad - B), (0, 0)))

    # Explicit VMEM budget (v7x: 64 MiB physical, 32 MiB default scoped).
    vmem_need = (2 * tb * k_pad * 4            # image tile, double-buffered f32
                 + 2 * tb * H_W * 4            # pp tile
                 + 2 * tb * OUT_W * 4          # output tile
                 + k_pad * NUM_FTRS_PAD * 2    # resident backbone weight (bf16, Buffered(1))
                 + PACK_ROWS * PACK_W * 2      # resident packed params (bf16, Buffered(1))
                 + 6 * tb * NUM_FTRS_PAD * 4)  # intermediates / headroom
    vmem_limit = int(min(max(vmem_need, 32 * 1024 * 1024), 64 * 1024 * 1024))

    out = pl.pallas_call(
        _kernel,
        out_shape=jax.ShapeDtypeStruct((b_pad, OUT_W), jnp.float32),
        grid=grid,
        in_specs=[
            pl.BlockSpec((tb, k_pad), lambda i: (i, 0)),              # image tile (f32)
            pl.BlockSpec((tb, H_W), lambda i: (i, 0)),                # pp placed at lanes 6..15
            pl.BlockSpec((k_pad, NUM_FTRS_PAD), lambda i: (0, 0),     # backbone weight,
                         pipeline_mode=pl.Buffered(1)),               #   resident, single-buffered
            pl.BlockSpec((PACK_ROWS, PACK_W), lambda i: (0, 0),       # packed params,
                         pipeline_mode=pl.Buffered(1)),               #   resident, single-buffered
        ],
        out_specs=pl.BlockSpec((tb, OUT_W), lambda i: (i, 0)),
        compiler_params=pltpu.CompilerParams(
            dimension_semantics=("parallel",),
            vmem_limit_bytes=vmem_limit),
    )(img, pp, wb_bf16, pbuf)

    y = out[:B]
    return y[:, 0:1], y[:, 1:2], y[:, 2:3]   # lane-dense output sliced outside the kernel


# --------------------------------------------------------------------- pure-JAX reference
def reference_forward(image, parameters, pm_material, P):
    B = image.shape[0]
    # The synthetic backbone is defined with bf16 weights/activations (matches the kernel).
    img = image.reshape(B, -1).astype(jnp.bfloat16).astype(jnp.float32)
    Wb = jnp.asarray(P["Wb"], jnp.float32).astype(jnp.bfloat16).astype(jnp.float32)
    feat = img @ Wb + P["bb"]

    def bn(x, p):
        g, be, mu, var = p
        return (x - mu) / jnp.sqrt(var + EPS) * g + be

    x = jnp.maximum(bn(feat @ P["W1"] + P["b1"], P["bn1"]), 0.0)
    x = jnp.concatenate([x, parameters, pm_material], axis=1)
    ys = []
    for br in P["branches"]:
        xb = x
        for (W, b, p) in br["hidden"]:
            xb = jnp.maximum(bn(xb @ W + b, p), 0.0)
        ys.append(xb @ br["Wo"] + br["bo"])
    return tuple(ys)


# --------------------------------------------------------------------------------- main
if __name__ == "__main__":
    key = jax.random.PRNGKey(0)
    k_img, k_prm, k_pmm, k_par = jax.random.split(key, 4)

    B, C, H, W = 2, 3, 16, 16
    image = jax.random.normal(k_img, (B, C, H, W), jnp.float32)        # NCHW, like PyTorch
    parameters = jax.random.normal(k_prm, (B, PARAMS_DIM), jnp.float32)
    pm_material = jax.random.normal(k_pmm, (B, PM_MATERIAL_DIM), jnp.float32)

    P = init_params(k_par, img_feat_dim=C * H * W)
    wb_bf16, pbuf = pack_params(P, img_feat_dim=C * H * W)

    y1, y2, y3 = jax.block_until_ready(
        regression_iron_loss_forward(image, parameters, pm_material, wb_bf16, pbuf))

    r1, r2, r3 = reference_forward(image, parameters, pm_material, P)
    np.testing.assert_allclose(np.asarray(y1), np.asarray(r1), rtol=1e-2, atol=1e-2)
    np.testing.assert_allclose(np.asarray(y2), np.asarray(r2), rtol=1e-2, atol=1e-2)
    np.testing.assert_allclose(np.asarray(y3), np.asarray(r3), rtol=1e-2, atol=1e-2)

    print("KERNEL_OK")
</pallas_src>

<mosaic_0001>
module attributes {stable_mosaic.version = 11 : i64} {
  func.func @_kernel(%arg0: i32, %arg1: memref<8x768xf32, #tpu.memory_space<vmem>>, %arg2: memref<8x128xf32, #tpu.memory_space<vmem>>, %arg3: memref<768x1024xbf16, #tpu.memory_space<vmem>>, %arg4: memref<1744x256xbf16, #tpu.memory_space<vmem>>, %arg5: memref<8x128xf32, #tpu.memory_space<vmem>>) attributes {dimension_semantics = [#tpu.dimension_semantics<parallel>], iteration_bounds = array<i64: 1>, scalar_prefetch = 0 : i64, scratch_operands = 0 : i64, tpu.core_type = #tpu.core_type<tc>, window_params = [{transform_indices = @transform_0, window_bounds = array<i64: 8, 768>}, {transform_indices = @transform_1, window_bounds = array<i64: 8, 128>}, {pipeline_mode = #tpu.pipeline_mode<synchronous>, transform_indices = @transform_2, window_bounds = array<i64: 768, 1024>}, {pipeline_mode = #tpu.pipeline_mode<synchronous>, transform_indices = @transform_3, window_bounds = array<i64: 1744, 256>}, {transform_indices = @transform_4, window_bounds = array<i64: 8, 128>}]} {
    %c0 = arith.constant 0 : index
    %c0_0 = arith.constant 0 : index
    %0 = vector.load %arg1[%c0, %c0_0] : memref<8x768xf32, #tpu.memory_space<vmem>>, vector<8x768xf32>
    %1 = arith.truncf %0 : vector<8x768xf32> to vector<8x768xbf16>
    %c0_1 = arith.constant 0 : index
    %c0_2 = arith.constant 0 : index
    %2 = vector.load %arg3[%c0_1, %c0_2] : memref<768x1024xbf16, #tpu.memory_space<vmem>>, vector<768x1024xbf16>
    %cst = arith.constant dense<0.000000e+00> : vector<8x1024xf32>
    %3 = tpu.matmul %1, %2, %cst {dimension_numbers = #tpu.dot_dimension_numbers<[1], [0], [0], [1], [0, 0, 1, 1], [], []>} : vector<8x768xbf16>, vector<768x1024xbf16>, vector<8x1024xf32> -> vector<8x1024xf32>
    %4 = arith.truncf %3 : vector<8x1024xf32> to vector<8x1024xbf16>
    %c0_3 = arith.constant 0 : index
    %c0_4 = arith.constant 0 : index
    %5 = vector.load %arg4[%c0_3, %c0_4] : memref<1744x256xbf16, #tpu.memory_space<vmem>>, vector<1024x128xbf16>
    %cst_5 = arith.constant dense<0.000000e+00> : vector<8x128xf32>
    %6 = tpu.matmul %4, %5, %cst_5 {dimension_numbers = #tpu.dot_dimension_numbers<[1], [0], [0], [1], [0, 0, 1, 1], [], []>} : vector<8x1024xbf16>, vector<1024x128xbf16>, vector<8x128xf32> -> vector<8x128xf32>
    %c1024 = arith.constant 1024 : index
    %c0_6 = arith.constant 0 : index
    %7 = vector.load %arg4[%c1024, %c0_6] : memref<1744x256xbf16, #tpu.memory_space<vmem>>, vector<1x128xbf16>
    %8 = arith.extf %7 : vector<1x128xbf16> to vector<1x128xf32>
    %9 = vector.broadcast %8 : vector<1x128xf32> to vector<8x128xf32>
    %10 = arith.addf %6, %9 : vector<8x128xf32>
    %cst_7 = arith.constant 0.000000e+00 : f32
    %11 = vector.broadcast %cst_7 : f32 to vector<8x128xf32>
    %12 = arith.maximumf %10, %11 : vector<8x128xf32>
    %c0_8 = arith.constant 0 : index
    %c0_9 = arith.constant 0 : index
    %13 = vector.load %arg2[%c0_8, %c0_9] : memref<8x128xf32, #tpu.memory_space<vmem>>, vector<8x128xf32>
    %14 = arith.addf %12, %13 : vector<8x128xf32>
    %15 = arith.truncf %14 : vector<8x128xf32> to vector<8x128xbf16>
    %c1040 = arith.constant 1040 : index
    %c0_10 = arith.constant 0 : index
    %16 = vector.load %arg4[%c1040, %c0_10] : memref<1744x256xbf16, #tpu.memory_space<vmem>>, vector<128x128xbf16>
    %cst_11 = arith.constant dense<0.000000e+00> : vector<8x128xf32>
    %17 = tpu.matmul %15, %16, %cst_11 {dimension_numbers = #tpu.dot_dimension_numbers<[1], [0], [0], [1], [0, 0, 1, 1], [], []>} : vector<8x128xbf16>, vector<128x128xbf16>, vector<8x128xf32> -> vector<8x128xf32>
    %c1168 = arith.constant 1168 : index
    %c0_12 = arith.constant 0 : index
    %18 = vector.load %arg4[%c1168, %c0_12] : memref<1744x256xbf16, #tpu.memory_space<vmem>>, vector<1x128xbf16>
    %19 = arith.extf %18 : vector<1x128xbf16> to vector<1x128xf32>
    %20 = vector.broadcast %19 : vector<1x128xf32> to vector<8x128xf32>
    %21 = arith.addf %17, %20 : vector<8x128xf32>
    %cst_13 = arith.constant 0.000000e+00 : f32
    %22 = vector.broadcast %cst_13 : f32 to vector<8x128xf32>
    %23 = arith.maximumf %21, %22 : vector<8x128xf32>
    %24 = arith.truncf %23 : vector<8x128xf32> to vector<8x128xbf16>
    %c1184 = arith.constant 1184 : index
    %c0_14 = arith.constant 0 : index
    %25 = vector.load %arg4[%c1184, %c0_14] : memref<1744x256xbf16, #tpu.memory_space<vmem>>, vector<128x128xbf16>
    %cst_15 = arith.constant dense<0.000000e+00> : vector<8x128xf32>
    %26 = tpu.matmul %24, %25, %cst_15 {dimension_numbers = #tpu.dot_dimension_numbers<[1], [0], [0], [1], [0, 0, 1, 1], [], []>} : vector<8x128xbf16>, vector<128x128xbf16>, vector<8x128xf32> -> vector<8x128xf32>
    %c1312 = arith.constant 1312 : index
    %c0_16 = arith.constant 0 : index
    %27 = vector.load %arg4[%c1312, %c0_16] : memref<1744x256xbf16, #tpu.memory_space<vmem>>, vector<1x128xbf16>
    %28 = arith.extf %27 : vector<1x128xbf16> to vector<1x128xf32>
    %29 = vector.broadcast %28 : vector<1x128xf32> to vector<8x128xf32>
    %30 = arith.addf %26, %29 : vector<8x128xf32>
    %cst_17 = arith.constant 0.000000e+00 : f32
    %31 = vector.broadcast %cst_17 : f32 to vector<8x128xf32>
    %32 = arith.maximumf %30, %31 : vector<8x128xf32>
    %33 = arith.truncf %32 : vector<8x128xf32> to vector<8x128xbf16>
    %c1328 = arith.constant 1328 : index
    %c0_18 = arith.constant 0 : index
    %34 = vector.load %arg4[%c1328, %c0_18] : memref<1744x256xbf16, #tpu.memory_space<vmem>>, vector<128x256xbf16>
    %cst_19 = arith.constant dense<0.000000e+00> : vector<8x256xf32>
    %35 = tpu.matmul %33, %34, %cst_19 {dimension_numbers = #tpu.dot_dimension_numbers<[1], [0], [0], [1], [0, 0, 1, 1], [], []>} : vector<8x128xbf16>, vector<128x256xbf16>, vector<8x256xf32> -> vector<8x256xf32>
    %c1456 = arith.constant 1456 : index
    %c0_20 = arith.constant 0 : index
    %36 = vector.load %arg4[%c1456, %c0_20] : memref<1744x256xbf16, #tpu.memory_space<vmem>>, vector<1x256xbf16>
    %37 = arith.extf %36 : vector<1x256xbf16> to vector<1x256xf32>
    %38 = vector.broadcast %37 : vector<1x256xf32> to vector<8x256xf32>
    %39 = arith.addf %35, %38 : vector<8x256xf32>
    %cst_21 = arith.constant 0.000000e+00 : f32
    %40 = vector.broadcast %cst_21 : f32 to vector<8x256xf32>
    %41 = arith.maximumf %39, %40 : vector<8x256xf32>
    %42 = arith.truncf %41 : vector<8x256xf32> to vector<8x256xbf16>
    %c1472 = arith.constant 1472 : index
    %c0_22 = arith.constant 0 : index
    %43 = vector.load %arg4[%c1472, %c0_22] : memref<1744x256xbf16, #tpu.memory_space<vmem>>, vector<256x128xbf16>
    %cst_23 = arith.constant dense<0.000000e+00> : vector<8x128xf32>
    %44 = tpu.matmul %42, %43, %cst_23 {dimension_numbers = #tpu.dot_dimension_numbers<[1], [0], [0], [1], [0, 0, 1, 1], [], []>} : vector<8x256xbf16>, vector<256x128xbf16>, vector<8x128xf32> -> vector<8x128xf32>
    %c1728 = arith.constant 1728 : index
    %c0_24 = arith.constant 0 : index
    %45 = vector.load %arg4[%c1728, %c0_24] : memref<1744x256xbf16, #tpu.memory_space<vmem>>, vector<1x128xbf16>
    %46 = arith.extf %45 : vector<1x128xbf16> to vector<1x128xf32>
    %47 = vector.broadcast %46 : vector<1x128xf32> to vector<8x128xf32>
    %48 = arith.addf %44, %47 : vector<8x128xf32>
    %c0_25 = arith.constant 0 : index
    %c0_26 = arith.constant 0 : index
    %49 = vector.load %arg5[%c0_25, %c0_26] : memref<8x128xf32, #tpu.memory_space<vmem>>, vector<8x128xf32>
    tpu.vector_store %arg5[%c0_25, %c0_26], %48 {strides = array<i32>} : memref<8x128xf32, #tpu.memory_space<vmem>>, vector<8x128xf32>,
    return
  }
  func.func @transform_0(%arg0: i32) -> (i32, i32) {
    %c0_i32 = arith.constant 0 : i32
    %c0_i32_0 = arith.constant 0 : i32
    return %arg0, %c0_i32 : i32, i32
  }
  func.func @transform_1(%arg0: i32) -> (i32, i32) {
    %c0_i32 = arith.constant 0 : i32
    %c0_i32_0 = arith.constant 0 : i32
    return %arg0, %c0_i32 : i32, i32
  }
  func.func @transform_2(%arg0: i32) -> (i32, i32) {
    %c0_i32 = arith.constant 0 : i32
    %c0_i32_0 = arith.constant 0 : i32
    %c0_i32_1 = arith.constant 0 : i32
    return %c0_i32, %c0_i32_0 : i32, i32
  }
  func.func @transform_3(%arg0: i32) -> (i32, i32) {
    %c0_i32 = arith.constant 0 : i32
    %c0_i32_0 = arith.constant 0 : i32
    %c0_i32_1 = arith.constant 0 : i32
    return %c0_i32, %c0_i32_0 : i32, i32
  }
  func.func @transform_4(%arg0: i32) -> (i32, i32) {
    %c0_i32 = arith.constant 0 : i32
    %c0_i32_0 = arith.constant 0 : i32
    return %arg0, %c0_i32 : i32, i32
  }
}

</mosaic_0001>

<bundles_post_ra>
// kernel: tpu_custom_call.1
= control target key start
LH: loop header
LB: loop body
LE: loop exit
PB: predicated region body
PF: predicated region fallthrough
CT: control target
= control target key end

     0   :  { %9 = vsyncpa [#allocation3], 0  ;;  %s5241_s0 = inlined_call_operand.hbm [shape: f32[8,768], index: 0, kind: input, shape index: {}]   ;;  %s5242_s1 = inlined_call_operand.hbm [shape: f32[8,128], index: 1, kind: input, shape index: {}]   ;;  %s5243_s2 = inlined_call_operand.hbm [shape: bf16[768,1024], index: 2, kind: input, shape index: {}]   ;;  %s5244_s3 = inlined_call_operand.hbm [shape: bf16[1744,256], index: 3, kind: input, shape index: {}]   ;;  %s5245_s4 = inlined_call_operand.hbm [shape: f32[8,128], index: 4, kind: output, shape index: {}]  }
   0x1   :  { %10 = vsyncpa [#allocation6], 0 }
   0x2   :  { %11 = vsyncpa [#allocation9], 0 }
   0x3   :  { %12 = vsyncpa [#allocation4], 0  ;;  %s5082_s15 = smov [#allocation5]   ;;  %s5083_s17 = smov [#allocation2]  }
   0x4   :  { %s29_s16 = sshll.u32 %s5082_s15, 4  ;;  %s19_s18 = sshll.u32 %s5083_s17, 4  ;;  %s30_s16 = int_to_ptr.vmem [resolvable:$true] %s29_s16  ;;  %s20_s18 = int_to_ptr.vmem [resolvable:$true] %s19_s18 }
   0x5   :  { %s4964_s21 = scalar_lea.hbm %s5242_s1, 128 }
   0x6   :  { %p4965_p0 = scmp.ne.s32.totalorder %s5242_s1, %s4964_s21  ;;  %p4968_p1 = scmp.lt.u32.totalorder %s4964_s21, %s5242_s1 }
   0x8   :  { %p4970_p2 = pnand %p4968_p1, %p4965_p0 }
   0xa   :  { %4973 = shalt.err (!%p4970_p2)
}
   0xb   :  { %s4974_s26 = scalar_lea.vmem %s30_s16, 128  ;;  %p4979_p4 = scmp.lt.s32.totalorder %s30_s16, %s30_s16 }
   0xc   :  { %p4975_p3 = scmp.ne.s32.totalorder %s30_s16, %s4974_s26  ;;  %p4980_p5 = scmp.lt.s32.totalorder %s4974_s26, %s4974_s26 }
   0xe   :  { %p4981_p6 = por %p4980_p5, %p4979_p4 }
  0x10   :  { %p4982_p7 = pnand %p4981_p6, %p4975_p3 }
  0x12   :  { %4985 = shalt.err (!%p4982_p7)
}
  0x13   :  { %32 = dma.hbm_to_vmem [thread:$0]  %s5242_s1, 128, %s30_s16, [#allocation6]  }
  0x14   :  { %s4986_s5 = scalar_lea.hbm %s5241_s0, 768 }
  0x15   :  { %p4987_p8 = scmp.ne.s32.totalorder %s5241_s0, %s4986_s5  ;;  %p4990_p9 = scmp.lt.u32.totalorder %s4986_s5, %s5241_s0 }
  0x17   :  { %p4992_p10 = pnand %p4990_p9, %p4987_p8 }
  0x19   :  { %4995 = shalt.err (!%p4992_p10)
}
  0x1a   :  { %s4996_s10 = scalar_lea.vmem %s20_s18, 768  ;;  %p5001_p12 = scmp.lt.s32.totalorder %s20_s18, %s20_s18 }
  0x1b   :  { %p4997_p11 = scmp.ne.s32.totalorder %s20_s18, %s4996_s10  ;;  %p5002_p13 = scmp.lt.s32.totalorder %s4996_s10, %s4996_s10 }
  0x1d   :  { %p5003_p0 = por %p5002_p13, %p5001_p12 }
  0x1f   :  { %p5004_p1 = pnand %p5003_p0, %p4997_p11 }
  0x21   :  { %5007 = shalt.err (!%p5004_p1)
}
  0x22   :  { %22 = dma.hbm_to_vmem [thread:$0]  %s5241_s0, 768, %s20_s18, [#allocation3]  }
  0x23   :  { %s5084_s12 = smov [#allocation7]   ;;  %s5008_s16 = scalar_lea.hbm %s5243_s2, 49152 }
  0x24   :  { %s38_s13 = sshll.u32 %s5084_s12, 4  ;;  %p5009_p2 = scmp.ne.s32.totalorder %s5243_s2, %s5008_s16  ;;  %s39_s13 = int_to_ptr.vmem [resolvable:$true] %s38_s13 }
  0x25   :  { %p5012_p3 = scmp.lt.u32.totalorder %s5008_s16, %s5243_s2 }
  0x27   :  { %p5014_p4 = pnand %p5012_p3, %p5009_p2 }
  0x29   :  { %5017 = shalt.err (!%p5014_p4)
}
  0x2a   :  { %s5018_s22 = scalar_lea.vmem %s39_s13, 49152  ;;  %p5023_p6 = scmp.lt.s32.totalorder %s39_s13, %s39_s13 }
  0x2b   :  { %p5019_p5 = scmp.ne.s32.totalorder %s39_s13, %s5018_s22  ;;  %p5024_p7 = scmp.lt.s32.totalorder %s5018_s22, %s5018_s22 }
  0x2d   :  { %p5025_p8 = por %p5024_p7, %p5023_p6 }
  0x2f   :  { %p5026_p9 = pnand %p5025_p8, %p5019_p5 }
  0x31   :  { %5029 = shalt.err (!%p5026_p9)
}
  0x32   :  { %s5085_s0 = smov 512   ;;  %s5086_s18 = smov 32  }
  0x33   :  { %44 = dma.hbm_to_vmem [thread:$0]  %s5243_s2, 49152, %s39_s13, [#allocation6], %s5085_s0, %s5085_s0, %s5086_s18  }
  0x34   :  { %s5087_s25 = smov [#allocation8]   ;;  %s5030_s29 = scalar_lea.hbm %s5244_s3, 27904 }
  0x35   :  { %s50_s26 = sshll.u32 %s5087_s25, 4  ;;  %p5031_p10 = scmp.ne.s32.totalorder %s5244_s3, %s5030_s29  ;;  %s51_s26 = int_to_ptr.vmem [resolvable:$true] %s50_s26 }
  0x36   :  { %p5034_p11 = scmp.lt.u32.totalorder %s5030_s29, %s5244_s3 }
  0x38   :  { %p5036_p12 = pnand %p5034_p11, %p5031_p10 }
  0x3a   :  { %5039 = shalt.err (!%p5036_p12)
}
  0x3b   :  { %s5040_s8 = scalar_lea.vmem %s51_s26, 27904  ;;  %p5045_p0 = scmp.lt.s32.totalorder %s51_s26, %s51_s26 }
  0x3c   :  { %p5041_p13 = scmp.ne.s32.totalorder %s51_s26, %s5040_s8  ;;  %p5046_p1 = scmp.lt.s32.totalorder %s5040_s8, %s5040_s8 }
  0x3e   :  { %p5047_p2 = por %p5046_p1, %p5045_p0 }
  0x40   :  { %p5048_p3 = pnand %p5047_p2, %p5041_p13 }
  0x42   :  { %5051 = shalt.err (!%p5048_p3)
}
  0x43   :  { %s5088_s2 = smov 128   ;;  %s5089_s9 = smov 8  }
  0x44   :  { %56 = dma.hbm_to_vmem [thread:$0]  %s5244_s3, 27904, %s51_s26, [#allocation9], %s5088_s2, %s5088_s2, %s5089_s9  }
  0x45   :  { %5074 = dma.done.wait [#allocation3], 768  }
  0x46   :  { %5075 = vsyncadd [#allocation3], 4294966528 }
  0x47   :  { %5076 = dma.done.wait [#allocation6], 49280  }
  0x48   :  { %5077 = vsyncadd [#allocation6], 4294918016 }
  0x49   :  { %5078 = dma.done.wait [#allocation9], 27904  }
  0x4a   :  { %5079 = vsyncadd [#allocation9], 4294939392  ;;  %v82_v0 = vld [vmem:[#allocation7] sm:$0xff]  ;;  %v83_v2 = vld [vmem:[#allocation7 + $0x8] sm:$0xff]  ;;  %vm5091_vm0 = vmmov 0   ;;  %s5093_s3 = smov [#allocation10]  }
  0x4b   :  { %v86_v1 = vld [vmem:[#allocation7 + $0x20] sm:$0xff]  ;;  %v87_v4 = vld [vmem:[#allocation7 + $0x28] sm:$0xff]  ;;  %v71_v53 = vld [vmem:[#allocation2 + $0x8] sm:$0xff]  ;;  %s4125_s11 = sshll.u32 %s5093_s3, 4  ;;  %s4126_s11 = int_to_ptr.vmem [resolvable:$true] %s4125_s11 }
  0x4c   :  { %v4137_v3 = vcombine.high %v82_v0, %v86_v1  ;;  %v4136_v5 = vcombine.low %v82_v0, %v86_v1  ;;  %v90_v6 = vld [vmem:[#allocation7 + $0x40] sm:$0xff]  ;;  %v4139_v8 = vcombine.high %v83_v2, %v87_v4  ;;  %v4138_v9 = vcombine.low %v83_v2, %v87_v4  ;;  %v91_v11 = vld [vmem:[#allocation7 + $0x48] sm:$0xff]  ;;  %s5052_s12 = scalar_lea.vmem %s4126_s11, 128  ;;  %p5057_p5 = scmp.lt.s32.totalorder %s4126_s11, %s4126_s11 }
  0x4d   :  { %v94_v7 = vld [vmem:[#allocation7 + $0x60] sm:$0xff]  ;;  %v95_v12 = vld [vmem:[#allocation7 + $0x68] sm:$0xff]  ;;  %v5167_v57 = vpack.c.bf16 %v71_v53, %v71_v53  ;;  %p5053_p4 = scmp.ne.s32.totalorder %s4126_s11, %s5052_s12  ;;  %p5058_p6 = scmp.lt.s32.totalorder %s5052_s12, %s5052_s12 }
  0x4e   :  { %v4145_v10 = vcombine.high %v90_v6, %v94_v7  ;;  %v98_v13 = vld [vmem:[#allocation7 + $0x80] sm:$0xff]  ;;  %2386 = vmatprep.subr.bf16.mxu0 %v4137_v3  ;;  %v4147_v14 = vcombine.high %v91_v11, %v95_v12  ;;  %v99_v16 = vld [vmem:[#allocation7 + $0x88] sm:$0xff]  ;;  %2509 = vmatprep.subr.bf16.mxu1 %v4139_v8  ;;  %v4144_v18 = vcombine.low %v90_v6, %v94_v7 }
  0x4f   :  { %v102_v15 = vld [vmem:[#allocation7 + $0xa0] sm:$0xff]  ;;  %v103_v17 = vld [vmem:[#allocation7 + $0xa8] sm:$0xff]  ;;  %2387 = vmatpush1.bf16.msra.mxu0 %v4136_v5  ;;  %2510 = vmatpush1.bf16.msra.mxu1 %v4138_v9  ;;  %v4146_v19 = vcombine.low %v91_v11, %v95_v12  ;;  %p5059_p7 = por %p5058_p6, %p5057_p5 }
  0x50   :  { %2388 = vmatprep.subr.bf16.mxu0 %v4145_v10  ;;  %v4153_v20 = vcombine.high %v98_v13, %v102_v15  ;;  %2511 = vmatprep.subr.bf16.mxu1 %v4147_v14  ;;  %v4155_v21 = vcombine.high %v99_v16, %v103_v17  ;;  %v106_v22 = vld [vmem:[#allocation7 + $0xc0] sm:$0xff]  ;;  %v107_v24 = vld [vmem:[#allocation7 + $0xc8] sm:$0xff]  ;;  %v4152_v26 = vcombine.low %v98_v13, %v102_v15 }
  0x51   :  { %v110_v23 = vld [vmem:[#allocation7 + $0xe0] sm:$0xff]  ;;  %v111_v25 = vld [vmem:[#allocation7 + $0xe8] sm:$0xff]  ;;  %v4154_v27 = vcombine.low %v99_v16, %v103_v17  ;;  %2418 = vmatprep.mubr.bf16.mxu0 %v5167_v57  ;;  %2541 = vmatprep.mubr.bf16.mxu1 %v5167_v57  ;;  %p5060_p8 = pnand %p5059_p7, %p5053_p4 }
  0x52   :  { %v4161_v28 = vcombine.high %v106_v22, %v110_v23  ;;  %v4163_v29 = vcombine.high %v107_v24, %v111_v25  ;;  %v114_v30 = vld [vmem:[#allocation7 + $0x100] sm:$0xff]  ;;  %v115_v32 = vld [vmem:[#allocation7 + $0x108] sm:$0xff]  ;;  %v4160_v34 = vcombine.low %v106_v22, %v110_v23  ;;  %v4162_v35 = vcombine.low %v107_v24, %v111_v25 }
  0x53   :  { %2389 = vmatpush1.bf16.msra.mxu0 %v4144_v18  ;;  %2512 = vmatpush1.bf16.msra.mxu1 %v4146_v19  ;;  %v118_v31 = vld [vmem:[#allocation7 + $0x120] sm:$0xff]  ;;  %v119_v33 = vld [vmem:[#allocation7 + $0x128] sm:$0xff] }
  0x54   :  { %2390 = vmatprep.subr.bf16.mxu0 %v4153_v20  ;;  %2513 = vmatprep.subr.bf16.mxu1 %v4155_v21  ;;  %v4169_v36 = vcombine.high %v114_v30, %v118_v31  ;;  %v4171_v37 = vcombine.high %v115_v32, %v119_v33  ;;  %v122_v38 = vld [vmem:[#allocation7 + $0x140] sm:$0xff]  ;;  %v123_v40 = vld [vmem:[#allocation7 + $0x148] sm:$0xff]  ;;  %v4168_v42 = vcombine.low %v114_v30, %v118_v31 }
  0x55   :  { %v126_v39 = vld [vmem:[#allocation7 + $0x160] sm:$0xff]  ;;  %v127_v41 = vld [vmem:[#allocation7 + $0x168] sm:$0xff]  ;;  %v4170_v43 = vcombine.low %v115_v32, %v119_v33 }
  0x56   :  { %v4177_v44 = vcombine.high %v122_v38, %v126_v39  ;;  %v4179_v45 = vcombine.high %v123_v40, %v127_v41  ;;  %v130_v46 = vld [vmem:[#allocation7 + $0x180] sm:$0xff]  ;;  %v131_v48 = vld [vmem:[#allocation7 + $0x188] sm:$0xff]  ;;  %v4176_v50 = vcombine.low %v122_v38, %v126_v39  ;;  %v4178_v51 = vcombine.low %v123_v40, %v127_v41 }
  0x57   :  { %2391 = vmatpush1.bf16.msra.mxu0 %v4152_v26  ;;  %2514 = vmatpush1.bf16.msra.mxu1 %v4154_v27  ;;  %v134_v47 = vld [vmem:[#allocation7 + $0x1a0] sm:$0xff]  ;;  %v135_v49 = vld [vmem:[#allocation7 + $0x1a8] sm:$0xff] }
  0x58   :  { %2392 = vmatprep.subr.bf16.mxu0 %v4161_v28  ;;  %2515 = vmatprep.subr.bf16.mxu1 %v4163_v29  ;;  %v4185_v52 = vcombine.high %v130_v46, %v134_v47  ;;  %v4187_v54 = vcombine.high %v131_v48, %v135_v49  ;;  %v138_v55 = vld [vmem:[#allocation7 + $0x1c0] sm:$0xff]  ;;  %v139_v58 = vld [vmem:[#allocation7 + $0x1c8] sm:$0xff]  ;;  %v4184_v60 = vcombine.low %v130_v46, %v134_v47 }
  0x59   :  { %v142_v56 = vld [vmem:[#allocation7 + $0x1e0] sm:$0xff]  ;;  %v143_v59 = vld [vmem:[#allocation7 + $0x1e8] sm:$0xff]  ;;  %v4186_v61 = vcombine.low %v131_v48, %v135_v49 }
  0x5a   :  { %v4193_v62 = vcombine.high %v138_v55, %v142_v56  ;;  %v4195_v63 = vcombine.high %v139_v58, %v143_v59  ;;  %v146_v0 = vld [vmem:[#allocation7 + $0x200] sm:$0xff]  ;;  %v147_v2 = vld [vmem:[#allocation7 + $0x208] sm:$0xff]  ;;  %v4192_v4 = vcombine.low %v138_v55, %v142_v56  ;;  %v4194_v5 = vcombine.low %v139_v58, %v143_v59 }
  0x5b   :  { %2393 = vmatpush1.bf16.msra.mxu0 %v4160_v34  ;;  %2516 = vmatpush1.bf16.msra.mxu1 %v4162_v35  ;;  %v150_v1 = vld [vmem:[#allocation7 + $0x220] sm:$0xff]  ;;  %v151_v3 = vld [vmem:[#allocation7 + $0x228] sm:$0xff] }
  0x5c   :  { %2394 = vmatprep.subr.bf16.mxu0 %v4169_v36  ;;  %2517 = vmatprep.subr.bf16.mxu1 %v4171_v37  ;;  %v4201_v6 = vcombine.high %v146_v0, %v150_v1  ;;  %v4203_v7 = vcombine.high %v147_v2, %v151_v3  ;;  %v154_v8 = vld [vmem:[#allocation7 + $0x240] sm:$0xff]  ;;  %v155_v10 = vld [vmem:[#allocation7 + $0x248] sm:$0xff]  ;;  %v4200_v12 = vcombine.low %v146_v0, %v150_v1 }
  0x5d   :  { %v158_v9 = vld [vmem:[#allocation7 + $0x260] sm:$0xff]  ;;  %v159_v11 = vld [vmem:[#allocation7 + $0x268] sm:$0xff]  ;;  %v4202_v13 = vcombine.low %v147_v2, %v151_v3 }
  0x5e   :  { %v4209_v14 = vcombine.high %v154_v8, %v158_v9  ;;  %v4211_v15 = vcombine.high %v155_v10, %v159_v11  ;;  %v162_v16 = vld [vmem:[#allocation7 + $0x280] sm:$0xff]  ;;  %v163_v18 = vld [vmem:[#allocation7 + $0x288] sm:$0xff]  ;;  %v4208_v20 = vcombine.low %v154_v8, %v158_v9  ;;  %v4210_v21 = vcombine.low %v155_v10, %v159_v11 }
  0x5f   :  { %2395 = vmatpush1.bf16.msra.mxu0 %v4168_v42  ;;  %2518 = vmatpush1.bf16.msra.mxu1 %v4170_v43  ;;  %v166_v17 = vld [vmem:[#allocation7 + $0x2a0] sm:$0xff]  ;;  %v167_v19 = vld [vmem:[#allocation7 + $0x2a8] sm:$0xff] }
  0x60   :  { %2396 = vmatprep.subr.bf16.mxu0 %v4177_v44  ;;  %2519 = vmatprep.subr.bf16.mxu1 %v4179_v45  ;;  %v4217_v22 = vcombine.high %v162_v16, %v166_v17  ;;  %v4219_v23 = vcombine.high %v163_v18, %v167_v19  ;;  %v170_v24 = vld [vmem:[#allocation7 + $0x2c0] sm:$0xff]  ;;  %v171_v26 = vld [vmem:[#allocation7 + $0x2c8] sm:$0xff]  ;;  %v4216_v28 = vcombine.low %v162_v16, %v166_v17 }
  0x61   :  { %v174_v25 = vld [vmem:[#allocation7 + $0x2e0] sm:$0xff]  ;;  %v175_v27 = vld [vmem:[#allocation7 + $0x2e8] sm:$0xff]  ;;  %v4218_v29 = vcombine.low %v163_v18, %v167_v19 }
  0x62   :  { %v4225_v30 = vcombine.high %v170_v24, %v174_v25  ;;  %v4227_v31 = vcombine.high %v171_v26, %v175_v27  ;;  %v178_v32 = vld [vmem:[#allocation7 + $0x300] sm:$0xff]  ;;  %v179_v34 = vld [vmem:[#allocation7 + $0x308] sm:$0xff]  ;;  %v4224_v36 = vcombine.low %v170_v24, %v174_v25  ;;  %v4226_v37 = vcombine.low %v171_v26, %v175_v27 }
  0x63   :  { %2397 = vmatpush1.bf16.msra.mxu0 %v4176_v50  ;;  %2520 = vmatpush1.bf16.msra.mxu1 %v4178_v51  ;;  %v182_v33 = vld [vmem:[#allocation7 + $0x320] sm:$0xff]  ;;  %v183_v35 = vld [vmem:[#allocation7 + $0x328] sm:$0xff] }
  0x64   :  { %2398 = vmatprep.subr.bf16.mxu0 %v4185_v52  ;;  %2521 = vmatprep.subr.bf16.mxu1 %v4187_v54  ;;  %v4233_v38 = vcombine.high %v178_v32, %v182_v33  ;;  %v4235_v39 = vcombine.high %v179_v34, %v183_v35  ;;  %v186_v40 = vld [vmem:[#allocation7 + $0x340] sm:$0xff]  ;;  %v187_v42 = vld [vmem:[#allocation7 + $0x348] sm:$0xff]  ;;  %v4232_v44 = vcombine.low %v178_v32, %v182_v33 }
  0x65   :  { %v190_v41 = vld [vmem:[#allocation7 + $0x360] sm:$0xff]  ;;  %v191_v43 = vld [vmem:[#allocation7 + $0x368] sm:$0xff]  ;;  %v4234_v45 = vcombine.low %v179_v34, %v183_v35 }
  0x66   :  { %v4241_v46 = vcombine.high %v186_v40, %v190_v41  ;;  %v4243_v47 = vcombine.high %v187_v42, %v191_v43  ;;  %v194_v48 = vld [vmem:[#allocation7 + $0x380] sm:$0xff]  ;;  %v195_v50 = vld [vmem:[#allocation7 + $0x388] sm:$0xff]  ;;  %v4240_v52 = vcombine.low %v186_v40, %v190_v41  ;;  %v4242_v53 = vcombine.low %v187_v42, %v191_v43 }
  0x67   :  { %2399 = vmatpush1.bf16.msra.mxu0 %v4184_v60  ;;  %2522 = vmatpush1.bf16.msra.mxu1 %v4186_v61  ;;  %v198_v49 = vld [vmem:[#allocation7 + $0x3a0] sm:$0xff]  ;;  %v199_v51 = vld [vmem:[#allocation7 + $0x3a8] sm:$0xff] }
  0x68   :  { %2400 = vmatprep.subr.bf16.mxu0 %v4193_v62  ;;  %2523 = vmatprep.subr.bf16.mxu1 %v4195_v63  ;;  %v4249_v54 = vcombine.high %v194_v48, %v198_v49  ;;  %v4251_v55 = vcombine.high %v195_v50, %v199_v51  ;;  %v202_v56 = vld [vmem:[#allocation7 + $0x3c0] sm:$0xff]  ;;  %v203_v59 = vld [vmem:[#allocation7 + $0x3c8] sm:$0xff]  ;;  %v4248_v61 = vcombine.low %v194_v48, %v198_v49 }
  0x69   :  { %v206_v58 = vld [vmem:[#allocation7 + $0x3e0] sm:$0xff]  ;;  %v207_v60 = vld [vmem:[#allocation7 + $0x3e8] sm:$0xff]  ;;  %v4250_v62 = vcombine.low %v195_v50, %v199_v51 }
  0x6a   :  { %v4257_v63 = vcombine.high %v202_v56, %v206_v58  ;;  %v4259_v0 = vcombine.high %v203_v59, %v207_v60  ;;  %v210_v1 = vld [vmem:[#allocation7 + $0x400] sm:$0xff]  ;;  %v211_v3 = vld [vmem:[#allocation7 + $0x408] sm:$0xff] }
  0x6b   :  { %2401 = vmatpush1.bf16.msra.mxu0 %v4192_v4  ;;  %2524 = vmatpush1.bf16.msra.mxu1 %v4194_v5  ;;  %v214_v2 = vld [vmem:[#allocation7 + $0x420] sm:$0xff]  ;;  %v215_v4 = vld [vmem:[#allocation7 + $0x428] sm:$0xff]  ;;  %v4256_v5 = vcombine.low %v202_v56, %v206_v58 }
  0x6c   :  { %2402 = vmatprep.subr.bf16.mxu0 %v4201_v6  ;;  %2525 = vmatprep.subr.bf16.mxu1 %v4203_v7  ;;  %v70_v6 = vld [vmem:[#allocation2] sm:$0xff]  ;;  %v4258_v7 = vcombine.low %v203_v59, %v207_v60  ;;  %v4265_v8 = vcombine.high %v210_v1, %v214_v2  ;;  %v4267_v9 = vcombine.high %v211_v3, %v215_v4  ;;  %v218_v10 = vld [vmem:[#allocation7 + $0x440] sm:$0xff] }
  0x6d   :  { %v222_v11 = vld [vmem:[#allocation7 + $0x460] sm:$0xff]  ;;  %v4264_v16 = vcombine.low %v210_v1, %v214_v2  ;;  %v4266_v17 = vcombine.low %v211_v3, %v215_v4  ;;  %v231_v24 = vld [vmem:[#allocation7 + $0x4a8] sm:$0xff] }
  0x6e   :  { %v4273_v18 = vcombine.high %v218_v10, %v222_v11  ;;  %v4272_v25 = vcombine.low %v218_v10, %v222_v11  ;;  %v239_v32 = vld [vmem:[#allocation7 + $0x4e8] sm:$0xff] }
  0x6f   :  { %2403 = vmatpush1.bf16.msra.mxu0 %v4200_v12  ;;  %2526 = vmatpush1.bf16.msra.mxu1 %v4202_v13  ;;  %v5171_v12 = vpack.c.bf16 %v70_v6, %v70_v6  ;;  %v219_v13 = vld [vmem:[#allocation7 + $0x448] sm:$0xff]  ;;  %v278_v6 = vld [vmem:[#allocation7 + $0x620] sm:$0xff] }
  0x70   :  { %2404 = vmatprep.subr.bf16.mxu0 %v4209_v14  ;;  %2527 = vmatprep.subr.bf16.mxu1 %v4211_v15  ;;  %v223_v14 = vld [vmem:[#allocation7 + $0x468] sm:$0xff]  ;;  %v73_v15 = vld [vmem:[#allocation2 + $0x18] sm:$0xff] }
  0x71   :  { %v4275_v19 = vcombine.high %v219_v13, %v223_v14  ;;  %v4274_v26 = vcombine.low %v219_v13, %v223_v14  ;;  %v247_v40 = vld [vmem:[#allocation7 + $0x528] sm:$0xff]  ;;  %v282_v14 = vld [vmem:[#allocation7 + $0x640] sm:$0xff] }
  0x72   :  { %v255_v48 = vld [vmem:[#allocation7 + $0x568] sm:$0xff] }
  0x73   :  { %2405 = vmatpush1.bf16.msra.mxu0 %v4208_v20  ;;  %2528 = vmatpush1.bf16.msra.mxu1 %v4210_v21  ;;  %v226_v20 = vld [vmem:[#allocation7 + $0x480] sm:$0xff]  ;;  %v263_v56 = vld [vmem:[#allocation7 + $0x5a8] sm:$0xff] }
  0x74   :  { %2406 = vmatprep.subr.bf16.mxu0 %v4217_v22  ;;  %2529 = vmatprep.subr.bf16.mxu1 %v4219_v23  ;;  %v230_v21 = vld [vmem:[#allocation7 + $0x4a0] sm:$0xff]  ;;  %v227_v22 = vld [vmem:[#allocation7 + $0x488] sm:$0xff]  ;;  %v5173_v23 = vpack.c.bf16 %v73_v15, %v73_v15 }
  0x75   :  { %v4281_v27 = vcombine.high %v226_v20, %v230_v21  ;;  %v4280_v33 = vcombine.low %v226_v20, %v230_v21  ;;  %v4282_v34 = vcombine.low %v227_v22, %v231_v24  ;;  %v271_v1 = vld [vmem:[#allocation7 + $0x5e8] sm:$0xff]  ;;  %v286_v15 = vld [vmem:[#allocation7 + $0x660] sm:$0xff] }
  0x76   :  { %v4337_v21 = vcombine.high %v282_v14, %v286_v15 }
  0x77   :  { %2407 = vmatpush1.bf16.msra.mxu0 %v4216_v28  ;;  %2530 = vmatpush1.bf16.msra.mxu1 %v4218_v29  ;;  %v234_v28 = vld [vmem:[#allocation7 + $0x4c0] sm:$0xff] }
  0x78   :  { %2408 = vmatprep.subr.bf16.mxu0 %v4225_v30  ;;  %2531 = vmatprep.subr.bf16.mxu1 %v4227_v31  ;;  %v238_v29 = vld [vmem:[#allocation7 + $0x4e0] sm:$0xff]  ;;  %v235_v30 = vld [vmem:[#allocation7 + $0x4c8] sm:$0xff]  ;;  %v4283_v31 = vcombine.high %v227_v22, %v231_v24 }
  0x79   :  { %v4289_v35 = vcombine.high %v234_v28, %v238_v29  ;;  %v4288_v41 = vcombine.low %v234_v28, %v238_v29  ;;  %v4290_v42 = vcombine.low %v235_v30, %v239_v32  ;;  %v290_v22 = vld [vmem:[#allocation7 + $0x680] sm:$0xff]  ;;  %v4336_v28 = vcombine.low %v282_v14, %v286_v15  ;;  %v72_v14 = vld [vmem:[#allocation2 + $0x10] sm:$0xff] }
  0x7a   :  { %v294_v24 = vld [vmem:[#allocation7 + $0x6a0] sm:$0xff] }
  0x7b   :  { %2409 = vmatpush1.bf16.msra.mxu0 %v4224_v36  ;;  %2532 = vmatpush1.bf16.msra.mxu1 %v4226_v37  ;;  %v242_v36 = vld [vmem:[#allocation7 + $0x500] sm:$0xff] }
  0x7c   :  { %2410 = vmatprep.subr.bf16.mxu0 %v4233_v38  ;;  %2533 = vmatprep.subr.bf16.mxu1 %v4235_v39  ;;  %v246_v37 = vld [vmem:[#allocation7 + $0x520] sm:$0xff]  ;;  %v243_v38 = vld [vmem:[#allocation7 + $0x508] sm:$0xff]  ;;  %v4291_v39 = vcombine.high %v235_v30, %v239_v32  ;;  %v4345_v30 = vcombine.high %v290_v22, %v294_v24 }
  0x7d   :  { %v4297_v43 = vcombine.high %v242_v36, %v246_v37  ;;  %v4296_v49 = vcombine.low %v242_v36, %v246_v37  ;;  %v4298_v50 = vcombine.low %v243_v38, %v247_v40  ;;  %v302_v32 = vld [vmem:[#allocation7 + $0x6e0] sm:$0xff]  ;;  %v4344_v36 = vcombine.low %v290_v22, %v294_v24  ;;  %v75_v24 = vld [vmem:[#allocation2 + $0x28] sm:$0xff] }
  0x7f   :  { %2411 = vmatpush1.bf16.msra.mxu0 %v4232_v44  ;;  %2534 = vmatpush1.bf16.msra.mxu1 %v4234_v45  ;;  %v250_v44 = vld [vmem:[#allocation7 + $0x540] sm:$0xff] }
  0x80   :  { %2412 = vmatprep.subr.bf16.mxu0 %v4241_v46  ;;  %2535 = vmatprep.subr.bf16.mxu1 %v4243_v47  ;;  %v254_v45 = vld [vmem:[#allocation7 + $0x560] sm:$0xff]  ;;  %v251_v46 = vld [vmem:[#allocation7 + $0x548] sm:$0xff]  ;;  %v4299_v47 = vcombine.high %v243_v38, %v247_v40 }
  0x81   :  { %v4305_v51 = vcombine.high %v250_v44, %v254_v45  ;;  %v4304_v58 = vcombine.low %v250_v44, %v254_v45  ;;  %v4306_v59 = vcombine.low %v251_v46, %v255_v48  ;;  %v310_v40 = vld [vmem:[#allocation7 + $0x720] sm:$0xff] }
  0x83   :  { %2413 = vmatpush1.bf16.msra.mxu0 %v4240_v52  ;;  %2536 = vmatpush1.bf16.msra.mxu1 %v4242_v53  ;;  %v258_v52 = vld [vmem:[#allocation7 + $0x580] sm:$0xff] }
  0x84   :  { %2414 = vmatprep.subr.bf16.mxu0 %v4249_v54  ;;  %2537 = vmatprep.subr.bf16.mxu1 %v4251_v55  ;;  %v262_v53 = vld [vmem:[#allocation7 + $0x5a0] sm:$0xff]  ;;  %v259_v54 = vld [vmem:[#allocation7 + $0x588] sm:$0xff]  ;;  %v4307_v55 = vcombine.high %v251_v46, %v255_v48 }
  0x85   :  { %v4313_v60 = vcombine.high %v258_v52, %v262_v53  ;;  %v4312_v2 = vcombine.low %v258_v52, %v262_v53  ;;  %v4314_v3 = vcombine.low %v259_v54, %v263_v56  ;;  %v318_v48 = vld [vmem:[#allocation7 + $0x760] sm:$0xff] }
  0x87   :  { %2415 = vmatpush1.bf16.msra.mxu0 %v4248_v61  ;;  %2538 = vmatpush1.bf16.msra.mxu1 %v4250_v62  ;;  %v266_v61 = vld [vmem:[#allocation7 + $0x5c0] sm:$0xff] }
  0x88   :  { %2416 = vmatprep.subr.bf16.mxu0 %v4257_v63  ;;  %2539 = vmatprep.subr.bf16.mxu1 %v4259_v0  ;;  %v270_v62 = vld [vmem:[#allocation7 + $0x5e0] sm:$0xff]  ;;  %v267_v63 = vld [vmem:[#allocation7 + $0x5c8] sm:$0xff]  ;;  %v4315_v0 = vcombine.high %v259_v54, %v263_v56 }
  0x89   :  { %v4321_v4 = vcombine.high %v266_v61, %v270_v62  ;;  %v4320_v10 = vcombine.low %v266_v61, %v270_v62  ;;  %v4322_v11 = vcombine.low %v267_v63, %v271_v1  ;;  %v326_v56 = vld [vmem:[#allocation7 + $0x7a0] sm:$0xff] }
  0x8b   :  { %2417 = vmatpush1.bf16.msra.mxu0 %v4256_v5  ;;  %2540 = vmatpush1.bf16.msra.mxu1 %v4258_v7  ;;  %v274_v5 = vld [vmem:[#allocation7 + $0x600] sm:$0xff]  ;;  %v275_v7 = vld [vmem:[#allocation7 + $0x608] sm:$0xff] }
  0x8c   :  { %2427 = vmatprep.subr.bf16.mxu0 %v4265_v8  ;;  %2550 = vmatprep.subr.bf16.mxu1 %v4267_v9  ;;  %v4323_v8 = vcombine.high %v267_v63, %v271_v1  ;;  %v279_v9 = vld [vmem:[#allocation7 + $0x628] sm:$0xff]  ;;  %v4329_v13 = vcombine.high %v274_v5, %v278_v6  ;;  %v334_v1 = vld [vmem:[#allocation7 + $0x7e0] sm:$0xff] }
  0x8d   :  { %v4330_v20 = vcombine.low %v275_v7, %v279_v9 }
  0x8e   :  { %2419 = vmatmul.mubr.bf16.vlgmr.msra.gmra.mrb[0].mxu0 %v5171_v12  ;;  %2542 = vmatmul.mubr.bf16.vlgmr.msra.gmra.mrb[0].mxu1 %v5171_v12 }
  0x8f   :  { %2428 = vmatpush1.bf16.msra.mxu0 %v4264_v16  ;;  %2551 = vmatpush1.bf16.msra.mxu1 %v4266_v17  ;;  %v283_v16 = vld [vmem:[#allocation7 + $0x648] sm:$0xff]  ;;  %v4331_v17 = vcombine.high %v275_v7, %v279_v9  ;;  %v342_v9 = vld [vmem:[#allocation7 + $0x820] sm:$0xff] }
  0x90   :  { %2429 = vmatprep.subr.bf16.mxu0 %v4273_v18  ;;  %2552 = vmatprep.subr.bf16.mxu1 %v4275_v19  ;;  %v287_v18 = vld [vmem:[#allocation7 + $0x668] sm:$0xff]  ;;  %v4328_v19 = vcombine.low %v274_v5, %v278_v6  ;;  %v338_v6 = vld [vmem:[#allocation7 + $0x800] sm:$0xff] }
  0x91   :  { %2459 = vmatprep.mubr.bf16.mxu0 %v5173_v23  ;;  %2582 = vmatprep.mubr.bf16.mxu1 %v5173_v23  ;;  %v4338_v29 = vcombine.low %v283_v16, %v287_v18 }
  0x93   :  { %2430 = vmatpush1.bf16.msra.mxu0 %v4272_v25  ;;  %2553 = vmatpush1.bf16.msra.mxu1 %v4274_v26  ;;  %v291_v25 = vld [vmem:[#allocation7 + $0x688] sm:$0xff]  ;;  %v4339_v26 = vcombine.high %v283_v16, %v287_v18  ;;  %v346_v16 = vld [vmem:[#allocation7 + $0x840] sm:$0xff]  ;;  %v4393_v18 = vcombine.high %v338_v6, %v342_v9 }
  0x94   :  { %2431 = vmatprep.subr.bf16.mxu0 %v4281_v27  ;;  %2554 = vmatprep.subr.bf16.mxu1 %v4283_v31  ;;  %v295_v27 = vld [vmem:[#allocation7 + $0x6a8] sm:$0xff]  ;;  %v298_v31 = vld [vmem:[#allocation7 + $0x6c0] sm:$0xff] }
  0x95   :  { %v4346_v37 = vcombine.low %v291_v25, %v295_v27  ;;  %v4353_v38 = vcombine.high %v298_v31, %v302_v32  ;;  %v4352_v44 = vcombine.low %v298_v31, %v302_v32  ;;  %v355_v31 = vld [vmem:[#allocation7 + $0x888] sm:$0xff] }
  0x97   :  { %2432 = vmatpush1.bf16.msra.mxu0 %v4280_v33  ;;  %2555 = vmatpush1.bf16.msra.mxu1 %v4282_v34  ;;  %v299_v33 = vld [vmem:[#allocation7 + $0x6c8] sm:$0xff]  ;;  %v4347_v34 = vcombine.high %v291_v25, %v295_v27  ;;  %v5179_v25 = vpack.c.bf16 %v72_v14, %v72_v14 }
  0x98   :  { %2433 = vmatprep.subr.bf16.mxu0 %v4289_v35  ;;  %2556 = vmatprep.subr.bf16.mxu1 %v4291_v39  ;;  %v303_v35 = vld [vmem:[#allocation7 + $0x6e8] sm:$0xff]  ;;  %v306_v39 = vld [vmem:[#allocation7 + $0x700] sm:$0xff] }
  0x99   :  { %v4354_v45 = vcombine.low %v299_v33, %v303_v35  ;;  %v4361_v46 = vcombine.high %v306_v39, %v310_v40  ;;  %v4360_v52 = vcombine.low %v306_v39, %v310_v40  ;;  %v366_v39 = vld [vmem:[#allocation7 + $0x8e0] sm:$0xff]  ;;  %v363_v40 = vld [vmem:[#allocation7 + $0x8c8] sm:$0xff] }
  0x9b   :  { %2434 = vmatpush1.bf16.msra.mxu0 %v4288_v41  ;;  %2557 = vmatpush1.bf16.msra.mxu1 %v4290_v42  ;;  %v307_v41 = vld [vmem:[#allocation7 + $0x708] sm:$0xff]  ;;  %v4355_v42 = vcombine.high %v299_v33, %v303_v35 }
  0x9c   :  { %2435 = vmatprep.subr.bf16.mxu0 %v4297_v43  ;;  %2558 = vmatprep.subr.bf16.mxu1 %v4299_v47  ;;  %v311_v43 = vld [vmem:[#allocation7 + $0x728] sm:$0xff]  ;;  %v314_v47 = vld [vmem:[#allocation7 + $0x740] sm:$0xff] }
  0x9d   :  { %v4362_v53 = vcombine.low %v307_v41, %v311_v43  ;;  %v4369_v54 = vcombine.high %v314_v47, %v318_v48  ;;  %v4368_v61 = vcombine.low %v314_v47, %v318_v48  ;;  %v359_v33 = vld [vmem:[#allocation7 + $0x8a8] sm:$0xff]  ;;  %v374_v47 = vld [vmem:[#allocation7 + $0x920] sm:$0xff] }
  0x9e   :  { %v371_v48 = vld [vmem:[#allocation7 + $0x908] sm:$0xff] }
  0x9f   :  { %2436 = vmatpush1.bf16.msra.mxu0 %v4296_v49  ;;  %2559 = vmatpush1.bf16.msra.mxu1 %v4298_v50  ;;  %v315_v49 = vld [vmem:[#allocation7 + $0x748] sm:$0xff]  ;;  %v4363_v50 = vcombine.high %v307_v41, %v311_v43  ;;  %v4411_v41 = vcombine.high %v355_v31, %v359_v33 }
  0xa0   :  { %2437 = vmatprep.subr.bf16.mxu0 %v4305_v51  ;;  %2560 = vmatprep.subr.bf16.mxu1 %v4307_v55  ;;  %v319_v51 = vld [vmem:[#allocation7 + $0x768] sm:$0xff]  ;;  %v322_v55 = vld [vmem:[#allocation7 + $0x780] sm:$0xff] }
  0xa1   :  { %v4370_v62 = vcombine.low %v315_v49, %v319_v51  ;;  %v4377_v63 = vcombine.high %v322_v55, %v326_v56  ;;  %v4376_v5 = vcombine.low %v322_v55, %v326_v56  ;;  %v382_v55 = vld [vmem:[#allocation7 + $0x960] sm:$0xff]  ;;  %v379_v56 = vld [vmem:[#allocation7 + $0x948] sm:$0xff] }
  0xa3   :  { %2438 = vmatpush1.bf16.msra.mxu0 %v4304_v58  ;;  %2561 = vmatpush1.bf16.msra.mxu1 %v4306_v59  ;;  %v323_v58 = vld [vmem:[#allocation7 + $0x788] sm:$0xff]  ;;  %v4371_v59 = vcombine.high %v315_v49, %v319_v51 }
  0xa4   :  { %2439 = vmatprep.subr.bf16.mxu0 %v4313_v60  ;;  %2562 = vmatprep.subr.bf16.mxu1 %v4315_v0  ;;  %v327_v60 = vld [vmem:[#allocation7 + $0x7a8] sm:$0xff]  ;;  %v330_v0 = vld [vmem:[#allocation7 + $0x7c0] sm:$0xff] }
  0xa5   :  { %v4378_v7 = vcombine.low %v323_v58, %v327_v60  ;;  %v4384_v15 = vcombine.low %v330_v0, %v334_v1 }
  0xa7   :  { %2440 = vmatpush1.bf16.msra.mxu0 %v4312_v2  ;;  %2563 = vmatpush1.bf16.msra.mxu1 %v4314_v3  ;;  %v331_v2 = vld [vmem:[#allocation7 + $0x7c8] sm:$0xff]  ;;  %v4379_v3 = vcombine.high %v323_v58, %v327_v60 }
  0xa8   :  { %2441 = vmatprep.subr.bf16.mxu0 %v4321_v4  ;;  %2564 = vmatprep.subr.bf16.mxu1 %v4323_v8  ;;  %v335_v4 = vld [vmem:[#allocation7 + $0x7e8] sm:$0xff]  ;;  %v4385_v8 = vcombine.high %v330_v0, %v334_v1  ;;  %v390_v0 = vld [vmem:[#allocation7 + $0x9a0] sm:$0xff] }
  0xa9   :  { %v387_v1 = vld [vmem:[#allocation7 + $0x988] sm:$0xff] }
  0xab   :  { %2442 = vmatpush1.bf16.msra.mxu0 %v4320_v10  ;;  %2565 = vmatpush1.bf16.msra.mxu1 %v4322_v11  ;;  %v339_v10 = vld [vmem:[#allocation7 + $0x808] sm:$0xff] }
  0xac   :  { %2443 = vmatprep.subr.bf16.mxu0 %v4329_v13  ;;  %2566 = vmatprep.subr.bf16.mxu1 %v4331_v17  ;;  %v343_v11 = vld [vmem:[#allocation7 + $0x828] sm:$0xff]  ;;  %v4387_v13 = vcombine.high %v331_v2, %v335_v4  ;;  %v4386_v17 = vcombine.low %v331_v2, %v335_v4 }
  0xad   :  { %v4395_v22 = vcombine.high %v339_v10, %v343_v11  ;;  %v4394_v27 = vcombine.low %v339_v10, %v343_v11  ;;  %v399_v11 = vld [vmem:[#allocation7 + $0x9e8] sm:$0xff] }
  0xaf   :  { %2444 = vmatpush1.bf16.msra.mxu0 %v4328_v19  ;;  %2567 = vmatpush1.bf16.msra.mxu1 %v4330_v20  ;;  %v350_v19 = vld [vmem:[#allocation7 + $0x860] sm:$0xff]  ;;  %v347_v20 = vld [vmem:[#allocation7 + $0x848] sm:$0xff] }
  0xb0   :  { %2445 = vmatprep.subr.bf16.mxu0 %v4337_v21  ;;  %2568 = vmatprep.subr.bf16.mxu1 %v4339_v26  ;;  %v351_v21 = vld [vmem:[#allocation7 + $0x868] sm:$0xff]  ;;  %v4392_v26 = vcombine.low %v338_v6, %v342_v9  ;;  %v4400_v35 = vcombine.low %v346_v16, %v350_v19 }
  0xb1   :  { %v4403_v32 = vcombine.high %v347_v20, %v351_v21  ;;  %v395_v9 = vld [vmem:[#allocation7 + $0x9c8] sm:$0xff] }
  0xb3   :  { %2446 = vmatpush1.bf16.msra.mxu0 %v4336_v28  ;;  %2569 = vmatpush1.bf16.msra.mxu1 %v4338_v29  ;;  %v4401_v28 = vcombine.high %v346_v16, %v350_v19  ;;  %v354_v29 = vld [vmem:[#allocation7 + $0x880] sm:$0xff]  ;;  %v4451_v19 = vcombine.high %v395_v9, %v399_v11 }
  0xb4   :  { %2447 = vmatprep.subr.bf16.mxu0 %v4345_v30  ;;  %2570 = vmatprep.subr.bf16.mxu1 %v4347_v34  ;;  %v358_v30 = vld [vmem:[#allocation7 + $0x8a0] sm:$0xff]  ;;  %v5181_v34 = vpack.c.bf16 %v75_v24, %v75_v24 }
  0xb5   :  { %v4408_v43 = vcombine.low %v354_v29, %v358_v30  ;;  %v402_v16 = vld [vmem:[#allocation7 + $0xa00] sm:$0xff] }
  0xb7   :  { %2448 = vmatpush1.bf16.msra.mxu0 %v4344_v36  ;;  %2571 = vmatpush1.bf16.msra.mxu1 %v4346_v37  ;;  %v4402_v36 = vcombine.low %v347_v20, %v351_v21  ;;  %v4409_v37 = vcombine.high %v354_v29, %v358_v30  ;;  %v407_v20 = vld [vmem:[#allocation7 + $0xa28] sm:$0xff] }
  0xb8   :  { %2449 = vmatprep.subr.bf16.mxu0 %v4353_v38  ;;  %2572 = vmatprep.subr.bf16.mxu1 %v4355_v42  ;;  %v362_v38 = vld [vmem:[#allocation7 + $0x8c0] sm:$0xff]  ;;  %v367_v42 = vld [vmem:[#allocation7 + $0x8e8] sm:$0xff] }
  0xb9   :  { %v4419_v49 = vcombine.high %v363_v40, %v367_v42  ;;  %v4416_v51 = vcombine.low %v362_v38, %v366_v39  ;;  %v415_v30 = vld [vmem:[#allocation7 + $0xa68] sm:$0xff] }
  0xbb   :  { %2450 = vmatpush1.bf16.msra.mxu0 %v4352_v44  ;;  %2573 = vmatpush1.bf16.msra.mxu1 %v4354_v45  ;;  %v4410_v44 = vcombine.low %v355_v31, %v359_v33  ;;  %v4417_v45 = vcombine.high %v362_v38, %v366_v39  ;;  %v423_v39 = vld [vmem:[#allocation7 + $0xaa8] sm:$0xff] }
  0xbc   :  { %2451 = vmatprep.subr.bf16.mxu0 %v4361_v46  ;;  %2574 = vmatprep.subr.bf16.mxu1 %v4363_v50  ;;  %v370_v46 = vld [vmem:[#allocation7 + $0x900] sm:$0xff]  ;;  %v375_v50 = vld [vmem:[#allocation7 + $0x928] sm:$0xff] }
  0xbd   :  { %v4427_v58 = vcombine.high %v371_v48, %v375_v50  ;;  %v4424_v60 = vcombine.low %v370_v46, %v374_v47 }
  0xbf   :  { %2452 = vmatpush1.bf16.msra.mxu0 %v4360_v52  ;;  %2575 = vmatpush1.bf16.msra.mxu1 %v4362_v53  ;;  %v4418_v52 = vcombine.low %v363_v40, %v367_v42  ;;  %v4425_v53 = vcombine.high %v370_v46, %v374_v47  ;;  %v431_v47 = vld [vmem:[#allocation7 + $0xae8] sm:$0xff] }
  0xc0   :  { %2453 = vmatprep.subr.bf16.mxu0 %v4369_v54  ;;  %2576 = vmatprep.subr.bf16.mxu1 %v4371_v59  ;;  %v378_v54 = vld [vmem:[#allocation7 + $0x940] sm:$0xff]  ;;  %v383_v59 = vld [vmem:[#allocation7 + $0x968] sm:$0xff] }
  0xc1   :  { %v4435_v2 = vcombine.high %v379_v56, %v383_v59  ;;  %v4432_v4 = vcombine.low %v378_v54, %v382_v55 }
  0xc3   :  { %2454 = vmatpush1.bf16.msra.mxu0 %v4368_v61  ;;  %2577 = vmatpush1.bf16.msra.mxu1 %v4370_v62  ;;  %v4426_v61 = vcombine.low %v371_v48, %v375_v50  ;;  %v4433_v62 = vcombine.high %v378_v54, %v382_v55  ;;  %v435_v54 = vld [vmem:[#allocation7 + $0xb08] sm:$0xff] }
  0xc4   :  { %2455 = vmatprep.subr.bf16.mxu0 %v4377_v63  ;;  %2578 = vmatprep.subr.bf16.mxu1 %v4379_v3  ;;  %v386_v63 = vld [vmem:[#allocation7 + $0x980] sm:$0xff]  ;;  %v391_v3 = vld [vmem:[#allocation7 + $0x9a8] sm:$0xff] }
  0xc5   :  { %v4441_v6 = vcombine.high %v386_v63, %v390_v0  ;;  %v4443_v10 = vcombine.high %v387_v1, %v391_v3  ;;  %v4442_v14 = vcombine.low %v387_v1, %v391_v3  ;;  %v439_v55 = vld [vmem:[#allocation7 + $0xb28] sm:$0xff] }
  0xc7   :  { %2456 = vmatpush1.bf16.msra.mxu0 %v4376_v5  ;;  %2579 = vmatpush1.bf16.msra.mxu1 %v4378_v7  ;;  %v4434_v5 = vcombine.low %v379_v56, %v383_v59  ;;  %v394_v7 = vld [vmem:[#allocation7 + $0x9c0] sm:$0xff] }
  0xc8   :  { %2457 = vmatprep.subr.bf16.mxu0 %v4385_v8  ;;  %2580 = vmatprep.subr.bf16.mxu1 %v4387_v13  ;;  %v398_v8 = vld [vmem:[#allocation7 + $0x9e0] sm:$0xff]  ;;  %v4440_v13 = vcombine.low %v386_v63, %v390_v0  ;;  %v443_v63 = vld [vmem:[#allocation7 + $0xb48] sm:$0xff] }
  0xc9   :  { %v4448_v21 = vcombine.low %v394_v7, %v398_v8  ;;  %v447_v0 = vld [vmem:[#allocation7 + $0xb68] sm:$0xff] }
  0xcb   :  { %2458 = vmatpush1.bf16.msra.mxu0 %v4384_v15  ;;  %2581 = vmatpush1.bf16.msra.mxu1 %v4386_v17  ;;  %v4449_v15 = vcombine.high %v394_v7, %v398_v8  ;;  %v406_v17 = vld [vmem:[#allocation7 + $0xa20] sm:$0xff]  ;;  %v451_v7 = vld [vmem:[#allocation7 + $0xb88] sm:$0xff] }
  0xcc   :  { %2468 = vmatprep.subr.bf16.mxu0 %v4393_v18  ;;  %2591 = vmatprep.subr.bf16.mxu1 %v4395_v22  ;;  %v403_v18 = vld [vmem:[#allocation7 + $0xa08] sm:$0xff]  ;;  %v4450_v22 = vcombine.low %v395_v9, %v399_v11  ;;  %v4457_v24 = vcombine.high %v402_v16, %v406_v17  ;;  %v4456_v31 = vcombine.low %v402_v16, %v406_v17 }
  0xcd   :  { %v4459_v29 = vcombine.high %v403_v18, %v407_v20  ;;  %v455_v8 = vld [vmem:[#allocation7 + $0xba8] sm:$0xff] }
  0xce   :  { %2460 = vmatmul.mubr.bf16.vlgmr.msra.gmra.mrb[0].mxu0 %v5179_v25  ;;  %2583 = vmatmul.mubr.bf16.vlgmr.msra.gmra.mrb[0].mxu1 %v5179_v25  ;;  %v459_v16 = vld [vmem:[#allocation7 + $0xbc8] sm:$0xff] }
  0xcf   :  { %2469 = vmatpush1.bf16.msra.mxu0 %v4392_v26  ;;  %2592 = vmatpush1.bf16.msra.mxu1 %v4394_v27  ;;  %v410_v26 = vld [vmem:[#allocation7 + $0xa40] sm:$0xff]  ;;  %v463_v17 = vld [vmem:[#allocation7 + $0xbe8] sm:$0xff] }
  0xd0   :  { %2470 = vmatprep.subr.bf16.mxu0 %v4401_v28  ;;  %2593 = vmatprep.subr.bf16.mxu1 %v4403_v32  ;;  %v414_v27 = vld [vmem:[#allocation7 + $0xa60] sm:$0xff]  ;;  %v411_v28 = vld [vmem:[#allocation7 + $0xa48] sm:$0xff]  ;;  %v4458_v32 = vcombine.low %v403_v18, %v407_v20 }
  0xd1   :  { %2500 = vmatprep.mubr.bf16.mxu0 %v5181_v34  ;;  %2623 = vmatprep.mubr.bf16.mxu1 %v5181_v34  ;;  %v4465_v33 = vcombine.high %v410_v26, %v414_v27  ;;  %v4467_v38 = vcombine.high %v411_v28, %v415_v30  ;;  %v4464_v40 = vcombine.low %v410_v26, %v414_v27  ;;  %v85_v26 = vld [vmem:[#allocation7 + $0x18] sm:$0xff] }
  0xd2   :  { %v89_v27 = vld [vmem:[#allocation7 + $0x38] sm:$0xff] }
  0xd3   :  { %2471 = vmatpush1.bf16.msra.mxu0 %v4400_v35  ;;  %2594 = vmatpush1.bf16.msra.mxu1 %v4402_v36  ;;  %v418_v35 = vld [vmem:[#allocation7 + $0xa80] sm:$0xff] }
  0xd4   :  { %2472 = vmatprep.subr.bf16.mxu0 %v4409_v37  ;;  %2595 = vmatprep.subr.bf16.mxu1 %v4411_v41  ;;  %v422_v36 = vld [vmem:[#allocation7 + $0xaa0] sm:$0xff]  ;;  %v419_v37 = vld [vmem:[#allocation7 + $0xa88] sm:$0xff]  ;;  %v4466_v41 = vcombine.low %v411_v28, %v415_v30  ;;  %v4514_v30 = vcombine.low %v459_v16, %v463_v17 }
  0xd5   :  { %v4473_v42 = vcombine.high %v418_v35, %v422_v36  ;;  %v4475_v46 = vcombine.high %v419_v37, %v423_v39  ;;  %v4472_v48 = vcombine.low %v418_v35, %v422_v36  ;;  %v96_v35 = vld [vmem:[#allocation7 + $0x70] sm:$0xff] }
  0xd7   :  { %2473 = vmatpush1.bf16.msra.mxu0 %v4408_v43  ;;  %2596 = vmatpush1.bf16.msra.mxu1 %v4410_v44  ;;  %v426_v43 = vld [vmem:[#allocation7 + $0xac0] sm:$0xff] }
  0xd8   :  { %2474 = vmatprep.subr.bf16.mxu0 %v4417_v45  ;;  %2597 = vmatprep.subr.bf16.mxu1 %v4419_v49  ;;  %v430_v44 = vld [vmem:[#allocation7 + $0xae0] sm:$0xff]  ;;  %v427_v45 = vld [vmem:[#allocation7 + $0xac8] sm:$0xff]  ;;  %v4474_v49 = vcombine.low %v419_v37, %v423_v39  ;;  %v93_v37 = vld [vmem:[#allocation7 + $0x58] sm:$0xff] }
  0xd9   :  { %v4481_v50 = vcombine.high %v426_v43, %v430_v44  ;;  %v4480_v56 = vcombine.low %v426_v43, %v430_v44  ;;  %v100_v43 = vld [vmem:[#allocation7 + $0x90] sm:$0xff] }
  0xda   :  { %v104_v44 = vld [vmem:[#allocation7 + $0xb0] sm:$0xff] }
  0xdb   :  { %2475 = vmatpush1.bf16.msra.mxu0 %v4416_v51  ;;  %2598 = vmatpush1.bf16.msra.mxu1 %v4418_v52  ;;  %v434_v51 = vld [vmem:[#allocation7 + $0xb00] sm:$0xff]  ;;  %v4483_v52 = vcombine.high %v427_v45, %v431_v47 }
  0xdc   :  { %2476 = vmatprep.subr.bf16.mxu0 %v4425_v53  ;;  %2599 = vmatprep.subr.bf16.mxu1 %v4427_v58  ;;  %v438_v53 = vld [vmem:[#allocation7 + $0xb20] sm:$0xff]  ;;  %v4482_v58 = vcombine.low %v427_v45, %v431_v47  ;;  %v101_v45 = vld [vmem:[#allocation7 + $0x98] sm:$0xff] }
  0xdd   :  { %v4489_v59 = vcombine.high %v434_v51, %v438_v53  ;;  %v4488_v1 = vcombine.low %v434_v51, %v438_v53  ;;  %v108_v51 = vld [vmem:[#allocation7 + $0xd0] sm:$0xff]  ;;  %v109_v53 = vld [vmem:[#allocation7 + $0xd8] sm:$0xff] }
  0xdf   :  { %2477 = vmatpush1.bf16.msra.mxu0 %v4424_v60  ;;  %2600 = vmatpush1.bf16.msra.mxu1 %v4426_v61  ;;  %v4491_v60 = vcombine.high %v435_v54, %v439_v55  ;;  %v442_v61 = vld [vmem:[#allocation7 + $0xb40] sm:$0xff] }
  0xe0   :  { %2478 = vmatprep.subr.bf16.mxu0 %v4433_v62  ;;  %2601 = vmatprep.subr.bf16.mxu1 %v4435_v2  ;;  %v446_v62 = vld [vmem:[#allocation7 + $0xb60] sm:$0xff]  ;;  %v4490_v2 = vcombine.low %v435_v54, %v439_v55  ;;  %v113_v54 = vld [vmem:[#allocation7 + $0xf8] sm:$0xff]  ;;  %v4156_v55 = vcombine.low %v100_v43, %v104_v44 }
  0xe1   :  { %v4497_v3 = vcombine.high %v442_v61, %v446_v62  ;;  %v4496_v9 = vcombine.low %v442_v61, %v446_v62  ;;  %v120_v61 = vld [vmem:[#allocation7 + $0x130] sm:$0xff]  ;;  %v117_v62 = vld [vmem:[#allocation7 + $0x118] sm:$0xff] }
  0xe3   :  { %2479 = vmatpush1.bf16.msra.mxu0 %v4432_v4  ;;  %2602 = vmatpush1.bf16.msra.mxu1 %v4434_v5  ;;  %v4499_v4 = vcombine.high %v443_v63, %v447_v0  ;;  %v450_v5 = vld [vmem:[#allocation7 + $0xb80] sm:$0xff] }
  0xe4   :  { %2480 = vmatprep.subr.bf16.mxu0 %v4441_v6  ;;  %2603 = vmatprep.subr.bf16.mxu1 %v4443_v10  ;;  %v454_v6 = vld [vmem:[#allocation7 + $0xba0] sm:$0xff]  ;;  %v4498_v10 = vcombine.low %v443_v63, %v447_v0  ;;  %v121_v63 = vld [vmem:[#allocation7 + $0x138] sm:$0xff] }
  0xe5   :  { %v4505_v11 = vcombine.high %v450_v5, %v454_v6  ;;  %v4504_v18 = vcombine.low %v450_v5, %v454_v6  ;;  %v125_v5 = vld [vmem:[#allocation7 + $0x158] sm:$0xff] }
  0xe6   :  { %v129_v6 = vld [vmem:[#allocation7 + $0x178] sm:$0xff] }
  0xe7   :  { %2481 = vmatpush1.bf16.msra.mxu0 %v4440_v13  ;;  %2604 = vmatpush1.bf16.msra.mxu1 %v4442_v14  ;;  %v4507_v13 = vcombine.high %v451_v7, %v455_v8  ;;  %v458_v14 = vld [vmem:[#allocation7 + $0xbc0] sm:$0xff] }
  0xe8   :  { %2482 = vmatprep.subr.bf16.mxu0 %v4449_v15  ;;  %2605 = vmatprep.subr.bf16.mxu1 %v4451_v19  ;;  %v462_v15 = vld [vmem:[#allocation7 + $0xbe0] sm:$0xff]  ;;  %v4506_v19 = vcombine.low %v451_v7, %v455_v8  ;;  %v4174_v8 = vcombine.low %v117_v62, %v121_v63 }
  0xe9   :  { %v4513_v20 = vcombine.high %v458_v14, %v462_v15  ;;  %v4512_v28 = vcombine.low %v458_v14, %v462_v15  ;;  %v133_v14 = vld [vmem:[#allocation7 + $0x198] sm:$0xff] }
  0xea   :  { %v137_v15 = vld [vmem:[#allocation7 + $0x1b8] sm:$0xff] }
  0xeb   :  { %2483 = vmatpush1.bf16.msra.mxu0 %v4448_v21  ;;  %2606 = vmatpush1.bf16.msra.mxu1 %v4450_v22  ;;  %v4515_v21 = vcombine.high %v459_v16, %v463_v17  ;;  %v84_v22 = vld [vmem:[#allocation7 + $0x10] sm:$0xff]  ;;  %v4182_v17 = vcombine.low %v125_v5, %v129_v6 }
  0xec   :  { %2484 = vmatprep.subr.bf16.mxu0 %v4457_v24  ;;  %2607 = vmatprep.subr.bf16.mxu1 %v4459_v29  ;;  %v88_v24 = vld [vmem:[#allocation7 + $0x30] sm:$0xff]  ;;  %v74_v29 = vld [vmem:[#allocation2 + $0x20] sm:$0xff] }
  0xed   :  { %v5187_v36 = vpack.c.bf16 %v74_v29, %v74_v29  ;;  %v4140_v39 = vcombine.low %v84_v22, %v88_v24 }
  0xef   :  { %2485 = vmatpush1.bf16.msra.mxu0 %v4456_v31  ;;  %2608 = vmatpush1.bf16.msra.mxu1 %v4458_v32  ;;  %v4141_v31 = vcombine.high %v84_v22, %v88_v24  ;;  %v4143_v32 = vcombine.high %v85_v26, %v89_v27  ;;  %v141_v22 = vld [vmem:[#allocation7 + $0x1d8] sm:$0xff] }
  0xf0   :  { %2486 = vmatprep.subr.bf16.mxu0 %v4465_v33  ;;  %2609 = vmatprep.subr.bf16.mxu1 %v4467_v38  ;;  %v92_v33 = vld [vmem:[#allocation7 + $0x50] sm:$0xff]  ;;  %v97_v38 = vld [vmem:[#allocation7 + $0x78] sm:$0xff] }
  0xf1   :  { %v4148_v47 = vcombine.low %v92_v33, %v96_v35  ;;  %v145_v24 = vld [vmem:[#allocation7 + $0x1f8] sm:$0xff] }
  0xf2   :  { %v4199_v29 = vcombine.high %v141_v22, %v145_v24 }
  0xf3   :  { %2487 = vmatpush1.bf16.msra.mxu0 %v4464_v40  ;;  %2610 = vmatpush1.bf16.msra.mxu1 %v4466_v41  ;;  %v4142_v40 = vcombine.low %v85_v26, %v89_v27  ;;  %v4149_v41 = vcombine.high %v92_v33, %v96_v35  ;;  %v4190_v27 = vcombine.low %v133_v14, %v137_v15  ;;  %v153_v33 = vld [vmem:[#allocation7 + $0x238] sm:$0xff] }
  0xf4   :  { %2488 = vmatprep.subr.bf16.mxu0 %v4473_v42  ;;  %2611 = vmatprep.subr.bf16.mxu1 %v4475_v46  ;;  %v4151_v42 = vcombine.high %v93_v37, %v97_v38  ;;  %v105_v46 = vld [vmem:[#allocation7 + $0xb8] sm:$0xff] }
  0xf7   :  { %2489 = vmatpush1.bf16.msra.mxu0 %v4472_v48  ;;  %2612 = vmatpush1.bf16.msra.mxu1 %v4474_v49  ;;  %v4150_v48 = vcombine.low %v93_v37, %v97_v38  ;;  %v4157_v49 = vcombine.high %v100_v43, %v104_v44  ;;  %v4198_v37 = vcombine.low %v141_v22, %v145_v24  ;;  %v161_v43 = vld [vmem:[#allocation7 + $0x278] sm:$0xff] }
  0xf8   :  { %2490 = vmatprep.subr.bf16.mxu0 %v4481_v50  ;;  %2613 = vmatprep.subr.bf16.mxu1 %v4483_v52  ;;  %v4159_v50 = vcombine.high %v101_v45, %v105_v46  ;;  %v112_v52 = vld [vmem:[#allocation7 + $0xf0] sm:$0xff] }
  0xf9   :  { %v4164_v0 = vcombine.low %v108_v51, %v112_v52 }
  0xfb   :  { %2491 = vmatpush1.bf16.msra.mxu0 %v4480_v56  ;;  %2614 = vmatpush1.bf16.msra.mxu1 %v4482_v58  ;;  %v4158_v56 = vcombine.low %v101_v45, %v105_v46  ;;  %v4165_v58 = vcombine.high %v108_v51, %v112_v52  ;;  %v169_v51 = vld [vmem:[#allocation7 + $0x2b8] sm:$0xff] }
  0xfc   :  { %2492 = vmatprep.subr.bf16.mxu0 %v4489_v59  ;;  %2615 = vmatprep.subr.bf16.mxu1 %v4491_v60  ;;  %v4167_v59 = vcombine.high %v109_v53, %v113_v54  ;;  %v116_v60 = vld [vmem:[#allocation7 + $0x110] sm:$0xff] }
  0xfd   :  { %v4172_v7 = vcombine.low %v116_v60, %v120_v61 }
  0xff   :  { %2493 = vmatpush1.bf16.msra.mxu0 %v4488_v1  ;;  %2616 = vmatpush1.bf16.msra.mxu1 %v4490_v2  ;;  %v4166_v1 = vcombine.low %v109_v53, %v113_v54  ;;  %v4173_v2 = vcombine.high %v116_v60, %v120_v61  ;;  %v177_v60 = vld [vmem:[#allocation7 + $0x2f8] sm:$0xff] }
 0x100   :  { %2494 = vmatprep.subr.bf16.mxu0 %v4497_v3  ;;  %2617 = vmatprep.subr.bf16.mxu1 %v4499_v4  ;;  %v124_v3 = vld [vmem:[#allocation7 + $0x150] sm:$0xff] }
 0x101   :  { %v128_v4 = vld [vmem:[#allocation7 + $0x170] sm:$0xff] }
 0x102   :  { %v4180_v16 = vcombine.low %v124_v3, %v128_v4 }
 0x103   :  { %2495 = vmatpush1.bf16.msra.mxu0 %v4496_v9  ;;  %2618 = vmatpush1.bf16.msra.mxu1 %v4498_v10  ;;  %v4181_v9 = vcombine.high %v124_v3, %v128_v4  ;;  %v4183_v10 = vcombine.high %v125_v5, %v129_v6  ;;  %v185_v3 = vld [vmem:[#allocation7 + $0x338] sm:$0xff] }
 0x104   :  { %2496 = vmatprep.subr.bf16.mxu0 %v4505_v11  ;;  %2619 = vmatprep.subr.bf16.mxu1 %v4507_v13  ;;  %v132_v11 = vld [vmem:[#allocation7 + $0x190] sm:$0xff] }
 0x105   :  { %v136_v13 = vld [vmem:[#allocation7 + $0x1b0] sm:$0xff] }
 0x106   :  { %v4188_v26 = vcombine.low %v132_v11, %v136_v13 }
 0x107   :  { %2497 = vmatpush1.bf16.msra.mxu0 %v4504_v18  ;;  %2620 = vmatpush1.bf16.msra.mxu1 %v4506_v19  ;;  %v4189_v18 = vcombine.high %v132_v11, %v136_v13  ;;  %v4191_v19 = vcombine.high %v133_v14, %v137_v15  ;;  %v193_v11 = vld [vmem:[#allocation7 + $0x378] sm:$0xff] }
 0x108   :  { %2498 = vmatprep.subr.bf16.mxu0 %v4513_v20  ;;  %2621 = vmatprep.subr.bf16.mxu1 %v4515_v21  ;;  %v140_v20 = vld [vmem:[#allocation7 + $0x1d0] sm:$0xff] }
 0x109   :  { %v144_v21 = vld [vmem:[#allocation7 + $0x1f0] sm:$0xff] }
 0x10a   :  { %v4196_v35 = vcombine.low %v140_v20, %v144_v21 }
 0x10b   :  { %2499 = vmatpush1.bf16.msra.mxu0 %v4512_v28  ;;  %2622 = vmatpush1.bf16.msra.mxu1 %v4514_v30  ;;  %v4197_v28 = vcombine.high %v140_v20, %v144_v21  ;;  %v148_v30 = vld [vmem:[#allocation7 + $0x210] sm:$0xff]  ;;  %v201_v20 = vld [vmem:[#allocation7 + $0x3b8] sm:$0xff] }
 0x10c   :  { %2632 = vmatprep.subr.bf16.mxu0 %v4141_v31  ;;  %2755 = vmatprep.subr.bf16.mxu1 %v4143_v32  ;;  %v152_v31 = vld [vmem:[#allocation7 + $0x230] sm:$0xff]  ;;  %v149_v32 = vld [vmem:[#allocation7 + $0x218] sm:$0xff] }
 0x10d   :  { %v4205_v38 = vcombine.high %v148_v30, %v152_v31  ;;  %v4204_v44 = vcombine.low %v148_v30, %v152_v31  ;;  %v4206_v45 = vcombine.low %v149_v32, %v153_v33  ;;  %v209_v30 = vld [vmem:[#allocation7 + $0x3f8] sm:$0xff] }
 0x10e   :  { %2501 = vmatmul.mubr.bf16.vlgmr.msra.gmra.mrb[0].mxu0 %v5187_v36  ;;  %2624 = vmatmul.mubr.bf16.vlgmr.msra.gmra.mrb[0].mxu1 %v5187_v36 }
 0x10f   :  { %2633 = vmatpush1.bf16.msra.mxu0 %v4140_v39  ;;  %2756 = vmatpush1.bf16.msra.mxu1 %v4142_v40  ;;  %v4207_v39 = vcombine.high %v149_v32, %v153_v33  ;;  %v156_v40 = vld [vmem:[#allocation7 + $0x250] sm:$0xff] }
 0x110   :  { %2634 = vmatprep.subr.bf16.mxu0 %v4149_v41  ;;  %2757 = vmatprep.subr.bf16.mxu1 %v4151_v42  ;;  %v160_v41 = vld [vmem:[#allocation7 + $0x270] sm:$0xff]  ;;  %v157_v42 = vld [vmem:[#allocation7 + $0x258] sm:$0xff] }
 0x111   :  { %2664 = vmatprep.mubr.bf16.mxu0 %v5167_v57  ;;  %2787 = vmatprep.mubr.bf16.mxu1 %v5167_v57  ;;  %v4175_v57 = vcombine.high %v117_v62, %v121_v63  ;;  %v4213_v46 = vcombine.high %v156_v40, %v160_v41  ;;  %v4212_v52 = vcombine.low %v156_v40, %v160_v41  ;;  %v217_v40 = vld [vmem:[#allocation7 + $0x438] sm:$0xff] }
 0x112   :  { %v4214_v53 = vcombine.low %v157_v42, %v161_v43 }
 0x113   :  { %2635 = vmatpush1.bf16.msra.mxu0 %v4148_v47  ;;  %2758 = vmatpush1.bf16.msra.mxu1 %v4150_v48  ;;  %v4215_v47 = vcombine.high %v157_v42, %v161_v43  ;;  %v164_v48 = vld [vmem:[#allocation7 + $0x290] sm:$0xff] }
 0x114   :  { %2636 = vmatprep.subr.bf16.mxu0 %v4157_v49  ;;  %2759 = vmatprep.subr.bf16.mxu1 %v4159_v50  ;;  %v168_v49 = vld [vmem:[#allocation7 + $0x2b0] sm:$0xff]  ;;  %v165_v50 = vld [vmem:[#allocation7 + $0x298] sm:$0xff] }
 0x115   :  { %v4221_v54 = vcombine.high %v164_v48, %v168_v49  ;;  %v4220_v61 = vcombine.low %v164_v48, %v168_v49  ;;  %v4222_v62 = vcombine.low %v165_v50, %v169_v51  ;;  %v225_v48 = vld [vmem:[#allocation7 + $0x478] sm:$0xff] }
 0x117   :  { %2637 = vmatpush1.bf16.msra.mxu0 %v4156_v55  ;;  %2760 = vmatpush1.bf16.msra.mxu1 %v4158_v56  ;;  %v4223_v55 = vcombine.high %v165_v50, %v169_v51  ;;  %v172_v56 = vld [vmem:[#allocation7 + $0x2d0] sm:$0xff] }
 0x118   :  { %2638 = vmatprep.subr.bf16.mxu0 %v4165_v58  ;;  %2761 = vmatprep.subr.bf16.mxu1 %v4167_v59  ;;  %v176_v58 = vld [vmem:[#allocation7 + $0x2f0] sm:$0xff]  ;;  %v173_v59 = vld [vmem:[#allocation7 + $0x2d8] sm:$0xff] }
 0x119   :  { %v4229_v63 = vcombine.high %v172_v56, %v176_v58  ;;  %v4228_v4 = vcombine.low %v172_v56, %v176_v58  ;;  %v4230_v5 = vcombine.low %v173_v59, %v177_v60  ;;  %v233_v56 = vld [vmem:[#allocation7 + $0x4b8] sm:$0xff] }
 0x11b   :  { %2639 = vmatpush1.bf16.msra.mxu0 %v4164_v0  ;;  %2762 = vmatpush1.bf16.msra.mxu1 %v4166_v1  ;;  %v4231_v0 = vcombine.high %v173_v59, %v177_v60  ;;  %v180_v1 = vld [vmem:[#allocation7 + $0x310] sm:$0xff] }
 0x11c   :  { %2640 = vmatprep.subr.bf16.mxu0 %v4173_v2  ;;  %2763 = vmatprep.subr.bf16.mxu1 %v4175_v57  ;;  %v184_v2 = vld [vmem:[#allocation7 + $0x330] sm:$0xff]  ;;  %v181_v57 = vld [vmem:[#allocation7 + $0x318] sm:$0xff] }
 0x11d   :  { %v4237_v6 = vcombine.high %v180_v1, %v184_v2  ;;  %v4236_v13 = vcombine.low %v180_v1, %v184_v2  ;;  %v4238_v14 = vcombine.low %v181_v57, %v185_v3  ;;  %v241_v1 = vld [vmem:[#allocation7 + $0x4f8] sm:$0xff] }
 0x11f   :  { %2641 = vmatpush1.bf16.msra.mxu0 %v4172_v7  ;;  %2764 = vmatpush1.bf16.msra.mxu1 %v4174_v8  ;;  %v4239_v7 = vcombine.high %v181_v57, %v185_v3  ;;  %v188_v8 = vld [vmem:[#allocation7 + $0x350] sm:$0xff] }
 0x120   :  { %2642 = vmatprep.subr.bf16.mxu0 %v4181_v9  ;;  %2765 = vmatprep.subr.bf16.mxu1 %v4183_v10  ;;  %v192_v9 = vld [vmem:[#allocation7 + $0x370] sm:$0xff]  ;;  %v189_v10 = vld [vmem:[#allocation7 + $0x358] sm:$0xff] }
 0x121   :  { %v4245_v15 = vcombine.high %v188_v8, %v192_v9  ;;  %v4244_v21 = vcombine.low %v188_v8, %v192_v9  ;;  %v4246_v22 = vcombine.low %v189_v10, %v193_v11 }
 0x123   :  { %2643 = vmatpush1.bf16.msra.mxu0 %v4180_v16  ;;  %2766 = vmatpush1.bf16.msra.mxu1 %v4182_v17  ;;  %v4247_v16 = vcombine.high %v189_v10, %v193_v11  ;;  %v196_v17 = vld [vmem:[#allocation7 + $0x390] sm:$0xff] }
 0x124   :  { %2644 = vmatprep.subr.bf16.mxu0 %v4189_v18  ;;  %2767 = vmatprep.subr.bf16.mxu1 %v4191_v19  ;;  %v200_v18 = vld [vmem:[#allocation7 + $0x3b0] sm:$0xff]  ;;  %v197_v19 = vld [vmem:[#allocation7 + $0x398] sm:$0xff] }
 0x125   :  { %v4253_v24 = vcombine.high %v196_v17, %v200_v18  ;;  %v4252_v31 = vcombine.low %v196_v17, %v200_v18  ;;  %v4254_v32 = vcombine.low %v197_v19, %v201_v20  ;;  %v252_v11 = vld [vmem:[#allocation7 + $0x550] sm:$0xff] }
 0x127   :  { %2645 = vmatpush1.bf16.msra.mxu0 %v4188_v26  ;;  %2768 = vmatpush1.bf16.msra.mxu1 %v4190_v27  ;;  %v4255_v26 = vcombine.high %v197_v19, %v201_v20  ;;  %v204_v27 = vld [vmem:[#allocation7 + $0x3d0] sm:$0xff] }
 0x128   :  { %2646 = vmatprep.subr.bf16.mxu0 %v4197_v28  ;;  %2769 = vmatprep.subr.bf16.mxu1 %v4199_v29  ;;  %v208_v28 = vld [vmem:[#allocation7 + $0x3f0] sm:$0xff]  ;;  %v205_v29 = vld [vmem:[#allocation7 + $0x3d8] sm:$0xff] }
 0x129   :  { %v4261_v33 = vcombine.high %v204_v27, %v208_v28  ;;  %v4260_v41 = vcombine.low %v204_v27, %v208_v28  ;;  %v4262_v42 = vcombine.low %v205_v29, %v209_v30  ;;  %v260_v20 = vld [vmem:[#allocation7 + $0x590] sm:$0xff] }
 0x12b   :  { %2647 = vmatpush1.bf16.msra.mxu0 %v4196_v35  ;;  %2770 = vmatpush1.bf16.msra.mxu1 %v4198_v37  ;;  %v4263_v35 = vcombine.high %v205_v29, %v209_v30  ;;  %v212_v37 = vld [vmem:[#allocation7 + $0x410] sm:$0xff] }
 0x12c   :  { %2648 = vmatprep.subr.bf16.mxu0 %v4205_v38  ;;  %2771 = vmatprep.subr.bf16.mxu1 %v4207_v39  ;;  %v216_v38 = vld [vmem:[#allocation7 + $0x430] sm:$0xff]  ;;  %v213_v39 = vld [vmem:[#allocation7 + $0x418] sm:$0xff] }
 0x12d   :  { %v4269_v43 = vcombine.high %v212_v37, %v216_v38  ;;  %v4268_v49 = vcombine.low %v212_v37, %v216_v38  ;;  %v4270_v50 = vcombine.low %v213_v39, %v217_v40  ;;  %v268_v30 = vld [vmem:[#allocation7 + $0x5d0] sm:$0xff] }
 0x12f   :  { %2649 = vmatpush1.bf16.msra.mxu0 %v4204_v44  ;;  %2772 = vmatpush1.bf16.msra.mxu1 %v4206_v45  ;;  %v4271_v44 = vcombine.high %v213_v39, %v217_v40  ;;  %v220_v45 = vld [vmem:[#allocation7 + $0x450] sm:$0xff] }
 0x130   :  { %2650 = vmatprep.subr.bf16.mxu0 %v4213_v46  ;;  %2773 = vmatprep.subr.bf16.mxu1 %v4215_v47  ;;  %v224_v46 = vld [vmem:[#allocation7 + $0x470] sm:$0xff]  ;;  %v221_v47 = vld [vmem:[#allocation7 + $0x458] sm:$0xff] }
 0x131   :  { %v4277_v51 = vcombine.high %v220_v45, %v224_v46  ;;  %v4276_v58 = vcombine.low %v220_v45, %v224_v46  ;;  %v4278_v59 = vcombine.low %v221_v47, %v225_v48  ;;  %v276_v40 = vld [vmem:[#allocation7 + $0x610] sm:$0xff] }
 0x133   :  { %2651 = vmatpush1.bf16.msra.mxu0 %v4212_v52  ;;  %2774 = vmatpush1.bf16.msra.mxu1 %v4214_v53  ;;  %v4279_v52 = vcombine.high %v221_v47, %v225_v48  ;;  %v228_v53 = vld [vmem:[#allocation7 + $0x490] sm:$0xff] }
 0x134   :  { %2652 = vmatprep.subr.bf16.mxu0 %v4221_v54  ;;  %2775 = vmatprep.subr.bf16.mxu1 %v4223_v55  ;;  %v232_v54 = vld [vmem:[#allocation7 + $0x4b0] sm:$0xff]  ;;  %v229_v55 = vld [vmem:[#allocation7 + $0x498] sm:$0xff] }
 0x135   :  { %v4285_v60 = vcombine.high %v228_v53, %v232_v54  ;;  %v4284_v2 = vcombine.low %v228_v53, %v232_v54  ;;  %v284_v48 = vld [vmem:[#allocation7 + $0x650] sm:$0xff] }
 0x137   :  { %2653 = vmatpush1.bf16.msra.mxu0 %v4220_v61  ;;  %2776 = vmatpush1.bf16.msra.mxu1 %v4222_v62  ;;  %v4287_v61 = vcombine.high %v229_v55, %v233_v56  ;;  %v236_v62 = vld [vmem:[#allocation7 + $0x4d0] sm:$0xff] }
 0x138   :  { %2654 = vmatprep.subr.bf16.mxu0 %v4229_v63  ;;  %2777 = vmatprep.subr.bf16.mxu1 %v4231_v0  ;;  %v240_v63 = vld [vmem:[#allocation7 + $0x4f0] sm:$0xff]  ;;  %v237_v0 = vld [vmem:[#allocation7 + $0x4d8] sm:$0xff] }
 0x139   :  { %v4293_v57 = vcombine.high %v236_v62, %v240_v63  ;;  %v4295_v3 = vcombine.high %v237_v0, %v241_v1  ;;  %v4292_v8 = vcombine.low %v236_v62, %v240_v63  ;;  %v4294_v9 = vcombine.low %v237_v0, %v241_v1  ;;  %v300_v1 = vld [vmem:[#allocation7 + $0x6d0] sm:$0xff] }
 0x13b   :  { %2655 = vmatpush1.bf16.msra.mxu0 %v4228_v4  ;;  %2778 = vmatpush1.bf16.msra.mxu1 %v4230_v5  ;;  %v244_v4 = vld [vmem:[#allocation7 + $0x510] sm:$0xff] }
 0x13c   :  { %2656 = vmatprep.subr.bf16.mxu0 %v4237_v6  ;;  %2779 = vmatprep.subr.bf16.mxu1 %v4239_v7  ;;  %v248_v5 = vld [vmem:[#allocation7 + $0x530] sm:$0xff]  ;;  %v245_v6 = vld [vmem:[#allocation7 + $0x518] sm:$0xff] }
 0x13d   :  { %v249_v7 = vld [vmem:[#allocation7 + $0x538] sm:$0xff]  ;;  %v4301_v10 = vcombine.high %v244_v4, %v248_v5 }
 0x13e   :  { %v4302_v17 = vcombine.low %v245_v6, %v249_v7 }
 0x13f   :  { %2657 = vmatpush1.bf16.msra.mxu0 %v4236_v13  ;;  %2780 = vmatpush1.bf16.msra.mxu1 %v4238_v14  ;;  %v256_v13 = vld [vmem:[#allocation7 + $0x570] sm:$0xff]  ;;  %v253_v14 = vld [vmem:[#allocation7 + $0x558] sm:$0xff] }
 0x140   :  { %2658 = vmatprep.subr.bf16.mxu0 %v4245_v15  ;;  %2781 = vmatprep.subr.bf16.mxu1 %v4247_v16  ;;  %v257_v15 = vld [vmem:[#allocation7 + $0x578] sm:$0xff]  ;;  %v4300_v16 = vcombine.low %v244_v4, %v248_v5  ;;  %v4309_v18 = vcombine.high %v252_v11, %v256_v13 }
 0x141   :  { %v4311_v19 = vcombine.high %v253_v14, %v257_v15  ;;  %v4310_v27 = vcombine.low %v253_v14, %v257_v15  ;;  %v316_v15 = vld [vmem:[#allocation7 + $0x750] sm:$0xff] }
 0x143   :  { %2659 = vmatpush1.bf16.msra.mxu0 %v4244_v21  ;;  %2782 = vmatpush1.bf16.msra.mxu1 %v4246_v22  ;;  %v264_v21 = vld [vmem:[#allocation7 + $0x5b0] sm:$0xff]  ;;  %v261_v22 = vld [vmem:[#allocation7 + $0x598] sm:$0xff] }
 0x144   :  { %2660 = vmatprep.subr.bf16.mxu0 %v4253_v24  ;;  %2783 = vmatprep.subr.bf16.mxu1 %v4255_v26  ;;  %v265_v24 = vld [vmem:[#allocation7 + $0x5b8] sm:$0xff]  ;;  %v4308_v26 = vcombine.low %v252_v11, %v256_v13  ;;  %v4317_v28 = vcombine.high %v260_v20, %v264_v21 }
 0x145   :  { %v4319_v29 = vcombine.high %v261_v22, %v265_v24  ;;  %v4318_v37 = vcombine.low %v261_v22, %v265_v24  ;;  %v324_v24 = vld [vmem:[#allocation7 + $0x790] sm:$0xff] }
 0x147   :  { %2661 = vmatpush1.bf16.msra.mxu0 %v4252_v31  ;;  %2784 = vmatpush1.bf16.msra.mxu1 %v4254_v32  ;;  %v272_v31 = vld [vmem:[#allocation7 + $0x5f0] sm:$0xff]  ;;  %v269_v32 = vld [vmem:[#allocation7 + $0x5d8] sm:$0xff] }
 0x148   :  { %2662 = vmatprep.subr.bf16.mxu0 %v4261_v33  ;;  %2785 = vmatprep.subr.bf16.mxu1 %v4263_v35  ;;  %v273_v33 = vld [vmem:[#allocation7 + $0x5f8] sm:$0xff]  ;;  %v4316_v35 = vcombine.low %v260_v20, %v264_v21  ;;  %v4325_v38 = vcombine.high %v268_v30, %v272_v31 }
 0x149   :  { %v4327_v39 = vcombine.high %v269_v32, %v273_v33  ;;  %v4326_v45 = vcombine.low %v269_v32, %v273_v33  ;;  %v332_v33 = vld [vmem:[#allocation7 + $0x7d0] sm:$0xff] }
 0x14b   :  { %2663 = vmatpush1.bf16.msra.mxu0 %v4260_v41  ;;  %2786 = vmatpush1.bf16.msra.mxu1 %v4262_v42  ;;  %v280_v41 = vld [vmem:[#allocation7 + $0x630] sm:$0xff]  ;;  %v277_v42 = vld [vmem:[#allocation7 + $0x618] sm:$0xff] }
 0x14c   :  { %2673 = vmatprep.subr.bf16.mxu0 %v4269_v43  ;;  %2796 = vmatprep.subr.bf16.mxu1 %v4271_v44  ;;  %v281_v43 = vld [vmem:[#allocation7 + $0x638] sm:$0xff]  ;;  %v4324_v44 = vcombine.low %v268_v30, %v272_v31  ;;  %v4333_v46 = vcombine.high %v276_v40, %v280_v41 }
 0x14d   :  { %v4335_v47 = vcombine.high %v277_v42, %v281_v43  ;;  %v4334_v53 = vcombine.low %v277_v42, %v281_v43  ;;  %v340_v43 = vld [vmem:[#allocation7 + $0x810] sm:$0xff] }
 0x14e   :  { %2665 = vmatmul.mubr.bf16.vlgmr.msra.gmra.mrb[4].mxu0 %v5171_v12  ;;  %2788 = vmatmul.mubr.bf16.vlgmr.msra.gmra.mrb[4].mxu1 %v5171_v12  ;;  %v4286_v12 = vcombine.low %v229_v55, %v233_v56  ;;  %v292_v56 = vld [vmem:[#allocation7 + $0x690] sm:$0xff] }
 0x14f   :  { %2674 = vmatpush1.bf16.msra.mxu0 %v4268_v49  ;;  %2797 = vmatpush1.bf16.msra.mxu1 %v4270_v50  ;;  %v288_v49 = vld [vmem:[#allocation7 + $0x670] sm:$0xff]  ;;  %v285_v50 = vld [vmem:[#allocation7 + $0x658] sm:$0xff] }
 0x150   :  { %2675 = vmatprep.subr.bf16.mxu0 %v4277_v51  ;;  %2798 = vmatprep.subr.bf16.mxu1 %v4279_v52  ;;  %v289_v51 = vld [vmem:[#allocation7 + $0x678] sm:$0xff]  ;;  %v4332_v52 = vcombine.low %v276_v40, %v280_v41  ;;  %v4341_v54 = vcombine.high %v284_v48, %v288_v49 }
 0x151   :  { %2705 = vmatprep.mubr.bf16.mxu0 %v5173_v23  ;;  %2828 = vmatprep.mubr.bf16.mxu1 %v5173_v23  ;;  %v4303_v23 = vcombine.high %v245_v6, %v249_v7  ;;  %v4343_v55 = vcombine.high %v285_v50, %v289_v51  ;;  %v4342_v62 = vcombine.low %v285_v50, %v289_v51  ;;  %v308_v7 = vld [vmem:[#allocation7 + $0x710] sm:$0xff] }
 0x152   :  { %v348_v51 = vld [vmem:[#allocation7 + $0x850] sm:$0xff] }
 0x153   :  { %2676 = vmatpush1.bf16.msra.mxu0 %v4276_v58  ;;  %2799 = vmatpush1.bf16.msra.mxu1 %v4278_v59  ;;  %v296_v58 = vld [vmem:[#allocation7 + $0x6b0] sm:$0xff]  ;;  %v293_v59 = vld [vmem:[#allocation7 + $0x698] sm:$0xff] }
 0x154   :  { %2677 = vmatprep.subr.bf16.mxu0 %v4285_v60  ;;  %2800 = vmatprep.subr.bf16.mxu1 %v4287_v61  ;;  %v297_v60 = vld [vmem:[#allocation7 + $0x6b8] sm:$0xff]  ;;  %v4340_v61 = vcombine.low %v284_v48, %v288_v49  ;;  %v4349_v63 = vcombine.high %v292_v56, %v296_v58 }
 0x155   :  { %v4351_v0 = vcombine.high %v293_v59, %v297_v60  ;;  %v4350_v4 = vcombine.low %v293_v59, %v297_v60  ;;  %v356_v60 = vld [vmem:[#allocation7 + $0x890] sm:$0xff] }
 0x157   :  { %2678 = vmatpush1.bf16.msra.mxu0 %v4284_v2  ;;  %2801 = vmatpush1.bf16.msra.mxu1 %v4286_v12  ;;  %v304_v2 = vld [vmem:[#allocation7 + $0x6f0] sm:$0xff]  ;;  %v301_v12 = vld [vmem:[#allocation7 + $0x6d8] sm:$0xff] }
 0x158   :  { %2679 = vmatprep.subr.bf16.mxu0 %v4293_v57  ;;  %2802 = vmatprep.subr.bf16.mxu1 %v4295_v3  ;;  %v305_v57 = vld [vmem:[#allocation7 + $0x6f8] sm:$0xff]  ;;  %v4348_v3 = vcombine.low %v292_v56, %v296_v58  ;;  %v4357_v5 = vcombine.high %v300_v1, %v304_v2 }
 0x159   :  { %v4359_v6 = vcombine.high %v301_v12, %v305_v57  ;;  %v4358_v11 = vcombine.low %v301_v12, %v305_v57  ;;  %v364_v57 = vld [vmem:[#allocation7 + $0x8d0] sm:$0xff] }
 0x15b   :  { %2680 = vmatpush1.bf16.msra.mxu0 %v4292_v8  ;;  %2803 = vmatpush1.bf16.msra.mxu1 %v4294_v9  ;;  %v312_v8 = vld [vmem:[#allocation7 + $0x730] sm:$0xff]  ;;  %v309_v9 = vld [vmem:[#allocation7 + $0x718] sm:$0xff] }
 0x15c   :  { %2681 = vmatprep.subr.bf16.mxu0 %v4301_v10  ;;  %2804 = vmatprep.subr.bf16.mxu1 %v4303_v23  ;;  %v313_v10 = vld [vmem:[#allocation7 + $0x738] sm:$0xff]  ;;  %v4356_v23 = vcombine.low %v300_v1, %v304_v2  ;;  %v4365_v13 = vcombine.high %v308_v7, %v312_v8 }
 0x15d   :  { %v4367_v14 = vcombine.high %v309_v9, %v313_v10  ;;  %v4366_v20 = vcombine.low %v309_v9, %v313_v10  ;;  %v372_v9 = vld [vmem:[#allocation7 + $0x910] sm:$0xff] }
 0x15e   :  { %v376_v10 = vld [vmem:[#allocation7 + $0x930] sm:$0xff] }
 0x15f   :  { %2682 = vmatpush1.bf16.msra.mxu0 %v4300_v16  ;;  %2805 = vmatpush1.bf16.msra.mxu1 %v4302_v17  ;;  %v320_v16 = vld [vmem:[#allocation7 + $0x770] sm:$0xff]  ;;  %v317_v17 = vld [vmem:[#allocation7 + $0x758] sm:$0xff] }
 0x160   :  { %2683 = vmatprep.subr.bf16.mxu0 %v4309_v18  ;;  %2806 = vmatprep.subr.bf16.mxu1 %v4311_v19  ;;  %v321_v18 = vld [vmem:[#allocation7 + $0x778] sm:$0xff]  ;;  %v4364_v19 = vcombine.low %v308_v7, %v312_v8  ;;  %v4373_v21 = vcombine.high %v316_v15, %v320_v16 }
 0x161   :  { %v4375_v22 = vcombine.high %v317_v17, %v321_v18  ;;  %v4374_v30 = vcombine.low %v317_v17, %v321_v18  ;;  %v384_v17 = vld [vmem:[#allocation7 + $0x970] sm:$0xff]  ;;  %v381_v18 = vld [vmem:[#allocation7 + $0x958] sm:$0xff] }
 0x163   :  { %2684 = vmatpush1.bf16.msra.mxu0 %v4308_v26  ;;  %2807 = vmatpush1.bf16.msra.mxu1 %v4310_v27  ;;  %v328_v26 = vld [vmem:[#allocation7 + $0x7b0] sm:$0xff]  ;;  %v325_v27 = vld [vmem:[#allocation7 + $0x798] sm:$0xff] }
 0x164   :  { %2685 = vmatprep.subr.bf16.mxu0 %v4317_v28  ;;  %2808 = vmatprep.subr.bf16.mxu1 %v4319_v29  ;;  %v329_v28 = vld [vmem:[#allocation7 + $0x7b8] sm:$0xff]  ;;  %v4372_v29 = vcombine.low %v316_v15, %v320_v16  ;;  %v4381_v31 = vcombine.high %v324_v24, %v328_v26  ;;  %v4429_v15 = vcombine.high %v372_v9, %v376_v10  ;;  %v380_v16 = vld [vmem:[#allocation7 + $0x950] sm:$0xff] }
 0x165   :  { %v4383_v32 = vcombine.high %v325_v27, %v329_v28  ;;  %v4382_v40 = vcombine.low %v325_v27, %v329_v28  ;;  %v392_v27 = vld [vmem:[#allocation7 + $0x9b0] sm:$0xff]  ;;  %v389_v28 = vld [vmem:[#allocation7 + $0x998] sm:$0xff] }
 0x167   :  { %2686 = vmatpush1.bf16.msra.mxu0 %v4316_v35  ;;  %2809 = vmatpush1.bf16.msra.mxu1 %v4318_v37  ;;  %v336_v35 = vld [vmem:[#allocation7 + $0x7f0] sm:$0xff]  ;;  %v333_v37 = vld [vmem:[#allocation7 + $0x7d8] sm:$0xff] }
 0x168   :  { %2687 = vmatprep.subr.bf16.mxu0 %v4325_v38  ;;  %2810 = vmatprep.subr.bf16.mxu1 %v4327_v39  ;;  %v337_v38 = vld [vmem:[#allocation7 + $0x7f8] sm:$0xff]  ;;  %v4380_v39 = vcombine.low %v324_v24, %v328_v26  ;;  %v4389_v41 = vcombine.high %v332_v33, %v336_v35  ;;  %v388_v26 = vld [vmem:[#allocation7 + $0x990] sm:$0xff] }
 0x169   :  { %v4391_v42 = vcombine.high %v333_v37, %v337_v38  ;;  %v4390_v48 = vcombine.low %v333_v37, %v337_v38  ;;  %v400_v37 = vld [vmem:[#allocation7 + $0x9f0] sm:$0xff]  ;;  %v397_v38 = vld [vmem:[#allocation7 + $0x9d8] sm:$0xff] }
 0x16b   :  { %2688 = vmatpush1.bf16.msra.mxu0 %v4324_v44  ;;  %2811 = vmatpush1.bf16.msra.mxu1 %v4326_v45  ;;  %v344_v44 = vld [vmem:[#allocation7 + $0x830] sm:$0xff]  ;;  %v341_v45 = vld [vmem:[#allocation7 + $0x818] sm:$0xff] }
 0x16c   :  { %2689 = vmatprep.subr.bf16.mxu0 %v4333_v46  ;;  %2812 = vmatprep.subr.bf16.mxu1 %v4335_v47  ;;  %v345_v46 = vld [vmem:[#allocation7 + $0x838] sm:$0xff]  ;;  %v4388_v47 = vcombine.low %v332_v33, %v336_v35  ;;  %v4397_v49 = vcombine.high %v340_v43, %v344_v44  ;;  %v396_v35 = vld [vmem:[#allocation7 + $0x9d0] sm:$0xff] }
 0x16d   :  { %v4399_v50 = vcombine.high %v341_v45, %v345_v46  ;;  %v4398_v56 = vcombine.low %v341_v45, %v345_v46  ;;  %v408_v45 = vld [vmem:[#allocation7 + $0xa30] sm:$0xff]  ;;  %v405_v46 = vld [vmem:[#allocation7 + $0xa18] sm:$0xff] }
 0x16f   :  { %2690 = vmatpush1.bf16.msra.mxu0 %v4332_v52  ;;  %2813 = vmatpush1.bf16.msra.mxu1 %v4334_v53  ;;  %v352_v52 = vld [vmem:[#allocation7 + $0x870] sm:$0xff]  ;;  %v349_v53 = vld [vmem:[#allocation7 + $0x858] sm:$0xff] }
 0x170   :  { %2691 = vmatprep.subr.bf16.mxu0 %v4341_v54  ;;  %2814 = vmatprep.subr.bf16.mxu1 %v4343_v55  ;;  %v353_v54 = vld [vmem:[#allocation7 + $0x878] sm:$0xff]  ;;  %v4396_v55 = vcombine.low %v340_v43, %v344_v44  ;;  %v4405_v58 = vcombine.high %v348_v51, %v352_v52  ;;  %v404_v44 = vld [vmem:[#allocation7 + $0xa10] sm:$0xff] }
 0x171   :  { %v4407_v59 = vcombine.high %v349_v53, %v353_v54  ;;  %v4406_v1 = vcombine.low %v349_v53, %v353_v54  ;;  %v416_v53 = vld [vmem:[#allocation7 + $0xa70] sm:$0xff]  ;;  %v413_v54 = vld [vmem:[#allocation7 + $0xa58] sm:$0xff] }
 0x173   :  { %2692 = vmatpush1.bf16.msra.mxu0 %v4340_v61  ;;  %2815 = vmatpush1.bf16.msra.mxu1 %v4342_v62  ;;  %v360_v61 = vld [vmem:[#allocation7 + $0x8b0] sm:$0xff]  ;;  %v357_v62 = vld [vmem:[#allocation7 + $0x898] sm:$0xff] }
 0x174   :  { %2693 = vmatprep.subr.bf16.mxu0 %v4349_v63  ;;  %2816 = vmatprep.subr.bf16.mxu1 %v4351_v0  ;;  %v361_v63 = vld [vmem:[#allocation7 + $0x8b8] sm:$0xff]  ;;  %v4404_v0 = vcombine.low %v348_v51, %v352_v52  ;;  %v4413_v2 = vcombine.high %v356_v60, %v360_v61  ;;  %v412_v52 = vld [vmem:[#allocation7 + $0xa50] sm:$0xff] }
 0x175   :  { %v4415_v12 = vcombine.high %v357_v62, %v361_v63 }
 0x177   :  { %2694 = vmatpush1.bf16.msra.mxu0 %v4348_v3  ;;  %2817 = vmatpush1.bf16.msra.mxu1 %v4350_v4  ;;  %v368_v3 = vld [vmem:[#allocation7 + $0x8f0] sm:$0xff]  ;;  %v365_v4 = vld [vmem:[#allocation7 + $0x8d8] sm:$0xff] }
 0x178   :  { %2695 = vmatprep.subr.bf16.mxu0 %v4357_v5  ;;  %2818 = vmatprep.subr.bf16.mxu1 %v4359_v6  ;;  %v369_v5 = vld [vmem:[#allocation7 + $0x8f8] sm:$0xff]  ;;  %v4412_v6 = vcombine.low %v356_v60, %v360_v61  ;;  %v4421_v7 = vcombine.high %v364_v57, %v368_v3  ;;  %v420_v61 = vld [vmem:[#allocation7 + $0xa90] sm:$0xff] }
 0x179   :  { %v4423_v8 = vcombine.high %v365_v4, %v369_v5 }
 0x17b   :  { %2696 = vmatpush1.bf16.msra.mxu0 %v4356_v23  ;;  %2819 = vmatpush1.bf16.msra.mxu1 %v4358_v11  ;;  %v373_v23 = vld [vmem:[#allocation7 + $0x918] sm:$0xff] }
 0x17c   :  { %2697 = vmatprep.subr.bf16.mxu0 %v4365_v13  ;;  %2820 = vmatprep.subr.bf16.mxu1 %v4367_v14  ;;  %v377_v11 = vld [vmem:[#allocation7 + $0x938] sm:$0xff]  ;;  %v4420_v13 = vcombine.low %v364_v57, %v368_v3  ;;  %v4422_v14 = vcombine.low %v365_v4, %v369_v5  ;;  %v428_v3 = vld [vmem:[#allocation7 + $0xad0] sm:$0xff] }
 0x17d   :  { %v432_v4 = vld [vmem:[#allocation7 + $0xaf0] sm:$0xff]  ;;  %v429_v5 = vld [vmem:[#allocation7 + $0xad8] sm:$0xff] }
 0x17f   :  { %2698 = vmatpush1.bf16.msra.mxu0 %v4364_v19  ;;  %2821 = vmatpush1.bf16.msra.mxu1 %v4366_v20  ;;  %v385_v19 = vld [vmem:[#allocation7 + $0x978] sm:$0xff]  ;;  %v4428_v20 = vcombine.low %v372_v9, %v376_v10  ;;  %v436_v10 = vld [vmem:[#allocation7 + $0xb10] sm:$0xff] }
 0x180   :  { %2699 = vmatprep.subr.bf16.mxu0 %v4373_v21  ;;  %2822 = vmatprep.subr.bf16.mxu1 %v4375_v22  ;;  %v4430_v21 = vcombine.low %v373_v23, %v377_v11  ;;  %v4437_v22 = vcombine.high %v380_v16, %v384_v17  ;;  %v4439_v24 = vcombine.high %v381_v18, %v385_v19 }
 0x183   :  { %2700 = vmatpush1.bf16.msra.mxu0 %v4372_v29  ;;  %2823 = vmatpush1.bf16.msra.mxu1 %v4374_v30  ;;  %v393_v29 = vld [vmem:[#allocation7 + $0x9b8] sm:$0xff]  ;;  %v4436_v30 = vcombine.low %v380_v16, %v384_v17  ;;  %v444_v17 = vld [vmem:[#allocation7 + $0xb50] sm:$0xff] }
 0x184   :  { %2701 = vmatprep.subr.bf16.mxu0 %v4381_v31  ;;  %2824 = vmatprep.subr.bf16.mxu1 %v4383_v32  ;;  %v4438_v31 = vcombine.low %v381_v18, %v385_v19  ;;  %v4445_v32 = vcombine.high %v388_v26, %v392_v27  ;;  %v4447_v33 = vcombine.high %v389_v28, %v393_v29  ;;  %v448_v18 = vld [vmem:[#allocation7 + $0xb70] sm:$0xff]  ;;  %v445_v19 = vld [vmem:[#allocation7 + $0xb58] sm:$0xff] }
 0x187   :  { %2702 = vmatpush1.bf16.msra.mxu0 %v4380_v39  ;;  %2825 = vmatpush1.bf16.msra.mxu1 %v4382_v40  ;;  %v401_v39 = vld [vmem:[#allocation7 + $0x9f8] sm:$0xff]  ;;  %v4444_v40 = vcombine.low %v388_v26, %v392_v27  ;;  %v452_v27 = vld [vmem:[#allocation7 + $0xb90] sm:$0xff] }
 0x188   :  { %2703 = vmatprep.subr.bf16.mxu0 %v4389_v41  ;;  %2826 = vmatprep.subr.bf16.mxu1 %v4391_v42  ;;  %v4446_v41 = vcombine.low %v389_v28, %v393_v29  ;;  %v4453_v42 = vcombine.high %v396_v35, %v400_v37  ;;  %v4455_v43 = vcombine.high %v397_v38, %v401_v39  ;;  %v456_v28 = vld [vmem:[#allocation7 + $0xbb0] sm:$0xff]  ;;  %v453_v29 = vld [vmem:[#allocation7 + $0xb98] sm:$0xff] }
 0x18b   :  { %2704 = vmatpush1.bf16.msra.mxu0 %v4388_v47  ;;  %2827 = vmatpush1.bf16.msra.mxu1 %v4390_v48  ;;  %v409_v47 = vld [vmem:[#allocation7 + $0xa38] sm:$0xff]  ;;  %v4452_v48 = vcombine.low %v396_v35, %v400_v37  ;;  %v460_v37 = vld [vmem:[#allocation7 + $0xbd0] sm:$0xff] }
 0x18c   :  { %2714 = vmatprep.subr.bf16.mxu0 %v4397_v49  ;;  %2837 = vmatprep.subr.bf16.mxu1 %v4399_v50  ;;  %v4454_v49 = vcombine.low %v397_v38, %v401_v39  ;;  %v4461_v50 = vcombine.high %v404_v44, %v408_v45  ;;  %v4463_v51 = vcombine.high %v405_v46, %v409_v47  ;;  %v464_v38 = vld [vmem:[#allocation7 + $0xbf0] sm:$0xff]  ;;  %v461_v39 = vld [vmem:[#allocation7 + $0xbd8] sm:$0xff] }
 0x18e   :  { %2706 = vmatmul.mubr.bf16.vlgmr.msra.gmra.mrb[4].mxu0 %v5179_v25  ;;  %2829 = vmatmul.mubr.bf16.vlgmr.msra.gmra.mrb[4].mxu1 %v5179_v25  ;;  %v4414_v25 = vcombine.low %v357_v62, %v361_v63  ;;  %v424_v62 = vld [vmem:[#allocation7 + $0xab0] sm:$0xff]  ;;  %v421_v63 = vld [vmem:[#allocation7 + $0xa98] sm:$0xff] }
 0x18f   :  { %2715 = vmatpush1.bf16.msra.mxu0 %v4396_v55  ;;  %2838 = vmatpush1.bf16.msra.mxu1 %v4398_v56  ;;  %v417_v55 = vld [vmem:[#allocation7 + $0xa78] sm:$0xff]  ;;  %v4460_v56 = vcombine.low %v404_v44, %v408_v45  ;;  %v4516_v45 = vcombine.low %v460_v37, %v464_v38 }
 0x190   :  { %2716 = vmatprep.subr.bf16.mxu0 %v4405_v58  ;;  %2839 = vmatprep.subr.bf16.mxu1 %v4407_v59  ;;  %v4462_v58 = vcombine.low %v405_v46, %v409_v47  ;;  %v4469_v59 = vcombine.high %v412_v52, %v416_v53  ;;  %v4471_v60 = vcombine.high %v413_v54, %v417_v55  ;;  %v4844_v47 = vld [vmem:[#allocation8 + $0x80] ss:$8 sps:$4 sm:$0xff]  }
 0x191   :  { %2746 = vmatprep.mubr.bf16.mxu0 %v5181_v34  ;;  %2869 = vmatprep.mubr.bf16.mxu1 %v5181_v34  ;;  %v4431_v34 = vcombine.high %v373_v23, %v377_v11  ;;  %v440_v23 = vld [vmem:[#allocation7 + $0xb30] sm:$0xff]  ;;  %v437_v11 = vld [vmem:[#allocation7 + $0xb18] sm:$0xff] }
 0x193   :  { %2717 = vmatpush1.bf16.msra.mxu0 %v4404_v0  ;;  %2840 = vmatpush1.bf16.msra.mxu1 %v4406_v1  ;;  %v425_v0 = vld [vmem:[#allocation7 + $0xab8] sm:$0xff]  ;;  %v4468_v1 = vcombine.low %v412_v52, %v416_v53 }
 0x194   :  { %2718 = vmatprep.subr.bf16.mxu0 %v4413_v2  ;;  %2841 = vmatprep.subr.bf16.mxu1 %v4415_v12  ;;  %v4470_v2 = vcombine.low %v413_v54, %v417_v55  ;;  %v4477_v12 = vcombine.high %v420_v61, %v424_v62  ;;  %v4479_v57 = vcombine.high %v421_v63, %v425_v0  ;;  %v4849_v52 = vld [vmem:[#allocation8 + $0x190] ss:$8 sps:$4 sm:$0xff]   ;;  %v4852_v55 = vld [vmem:[#allocation8 + $0xa0] ss:$8 sps:$4 sm:$0xff]  }
 0x195   :  { %v4850_v53 = vld [vmem:[#allocation8 + $0x10] ss:$8 sps:$4 sm:$0xff]  }
 0x196   :  { %v4851_v54 = vld [vmem:[#allocation8 + $0x110] ss:$8 sps:$4 sm:$0xff]  }
 0x197   :  { %2719 = vmatpush1.bf16.msra.mxu0 %v4412_v6  ;;  %2842 = vmatpush1.bf16.msra.mxu1 %v4414_v25  ;;  %v433_v6 = vld [vmem:[#allocation7 + $0xaf8] sm:$0xff]  ;;  %v4476_v25 = vcombine.low %v420_v61, %v424_v62 }
 0x198   :  { %2720 = vmatprep.subr.bf16.mxu0 %v4421_v7  ;;  %2843 = vmatprep.subr.bf16.mxu1 %v4423_v8  ;;  %v4478_v7 = vcombine.low %v421_v63, %v425_v0  ;;  %v4485_v8 = vcombine.high %v428_v3, %v432_v4  ;;  %v4487_v9 = vcombine.high %v429_v5, %v433_v6  ;;  %v4857_v61 = vld [vmem:[#allocation8 + $0x1b0] ss:$8 sps:$4 sm:$0xff]   ;;  %v4860_v63 = vld [vmem:[#allocation8 + $0xc0] ss:$8 sps:$4 sm:$0xff]  }
 0x199   :  { %v4858_v62 = vld [vmem:[#allocation8 + $0x30] ss:$8 sps:$4 sm:$0xff]   ;;  %v4861_v0 = vld [vmem:[#allocation8 + $0x1c0] ss:$8 sps:$4 sm:$0xff]  }
 0x19b   :  { %2721 = vmatpush1.bf16.msra.mxu0 %v4420_v13  ;;  %2844 = vmatpush1.bf16.msra.mxu1 %v4422_v14  ;;  %v441_v13 = vld [vmem:[#allocation7 + $0xb38] sm:$0xff]  ;;  %v4484_v14 = vcombine.low %v428_v3, %v432_v4 }
 0x19c   :  { %2722 = vmatprep.subr.bf16.mxu0 %v4429_v15  ;;  %2845 = vmatprep.subr.bf16.mxu1 %v4431_v34  ;;  %v4486_v15 = vcombine.low %v429_v5, %v433_v6  ;;  %v4493_v34 = vcombine.high %v436_v10, %v440_v23  ;;  %v4495_v16 = vcombine.high %v437_v11, %v441_v13  ;;  %v4866_v3 = vld [vmem:[#allocation8 + $0x50] ss:$8 sps:$4 sm:$0xff]   ;;  %v4868_v5 = vld [vmem:[#allocation8 + $0xe0] ss:$8 sps:$4 sm:$0xff]  }
 0x19d   :  { %v4867_v4 = vld [vmem:[#allocation8 + $0x150] ss:$8 sps:$4 sm:$0xff]  }
 0x19f   :  { %2723 = vmatpush1.bf16.msra.mxu0 %v4428_v20  ;;  %2846 = vmatpush1.bf16.msra.mxu1 %v4430_v21  ;;  %v449_v20 = vld [vmem:[#allocation7 + $0xb78] sm:$0xff]  ;;  %v4492_v21 = vcombine.low %v436_v10, %v440_v23 }
 0x1a0   :  { %2724 = vmatprep.subr.bf16.mxu0 %v4437_v22  ;;  %2847 = vmatprep.subr.bf16.mxu1 %v4439_v24  ;;  %v4494_v22 = vcombine.low %v437_v11, %v441_v13  ;;  %v4501_v24 = vcombine.high %v444_v17, %v448_v18  ;;  %v4503_v26 = vcombine.high %v445_v19, %v449_v20  ;;  %v4870_v11 = vld [vmem:[#allocation8 + $0x60] ss:$8 sps:$4 sm:$0xff]  }
 0x1a3   :  { %2725 = vmatpush1.bf16.msra.mxu0 %v4436_v30  ;;  %2848 = vmatpush1.bf16.msra.mxu1 %v4438_v31  ;;  %v457_v30 = vld [vmem:[#allocation7 + $0xbb8] sm:$0xff]  ;;  %v4500_v31 = vcombine.low %v444_v17, %v448_v18 }
 0x1a4   :  { %2726 = vmatprep.subr.bf16.mxu0 %v4445_v32  ;;  %2849 = vmatprep.subr.bf16.mxu1 %v4447_v33  ;;  %v4502_v32 = vcombine.low %v445_v19, %v449_v20  ;;  %v4509_v33 = vcombine.high %v452_v27, %v456_v28  ;;  %v4511_v35 = vcombine.high %v453_v29, %v457_v30  ;;  %v4873_v18 = vld [vmem:[#allocation8 + $0x1f0] ss:$8 sps:$4 sm:$0xff]  }
 0x1a5   :  { %v4874_v19 = vld [vmem:[#allocation8 + $0x70] ss:$8 sps:$4 sm:$0xff]  }
 0x1a6   :  { %v4875_v20 = vld [vmem:[#allocation8 + $0x170] ss:$8 sps:$4 sm:$0xff]  }
 0x1a7   :  { %2727 = vmatpush1.bf16.msra.mxu0 %v4444_v40  ;;  %2850 = vmatpush1.bf16.msra.mxu1 %v4446_v41  ;;  %v465_v40 = vld [vmem:[#allocation7 + $0xbf8] sm:$0xff]  ;;  %v4508_v41 = vcombine.low %v452_v27, %v456_v28  ;;  %v4879_v27 = vld [vmem:[#allocation8 + $0x300] ss:$8 sps:$4 sm:$0xff]  }
 0x1a8   :  { %2728 = vmatprep.subr.bf16.mxu0 %v4453_v42  ;;  %2851 = vmatprep.subr.bf16.mxu1 %v4455_v43  ;;  %v4510_v42 = vcombine.low %v453_v29, %v457_v30  ;;  %v4517_v43 = vcombine.high %v460_v37, %v464_v38  ;;  %v4519_v44 = vcombine.high %v461_v39, %v465_v40  ;;  %v4880_v28 = vld [vmem:[#allocation8 + $0x290] ss:$8 sps:$4 sm:$0xff]   ;;  %v4886_v37 = vld [vmem:[#allocation8 + $0x220] ss:$8 sps:$4 sm:$0xff]  }
 0x1a9   :  { %v4518_v46 = vcombine.low %v461_v39, %v465_v40  ;;  %v4881_v30 = vld [vmem:[#allocation8 + $0x390] ss:$8 sps:$4 sm:$0xff]   ;;  %v4887_v38 = vld [vmem:[#allocation8 + $0x320] ss:$8 sps:$4 sm:$0xff]  }
 0x1aa   :  { %v4888_v39 = vld [vmem:[#allocation8 + $0x2b0] ss:$8 sps:$4 sm:$0xff]  }
 0x1ab   :  { %2729 = vmatpush1.bf16.msra.mxu0 %v4452_v48  ;;  %2852 = vmatpush1.bf16.msra.mxu1 %v4454_v49  ;;  %v4845_v48 = vld [vmem:[#allocation8 + $0x180] ss:$8 sps:$4 sm:$0xff]   ;;  %v4889_v40 = vld [vmem:[#allocation8 + $0x3b0] ss:$8 sps:$4 sm:$0xff]  }
 0x1ac   :  { %2730 = vmatprep.subr.bf16.mxu0 %v4461_v50  ;;  %2853 = vmatprep.subr.bf16.mxu1 %v4463_v51  ;;  %v4846_v49 = vld [vmem:[#allocation8] ss:$8 sps:$4 sm:$0xff]   ;;  %v4848_v51 = vld [vmem:[#allocation8 + $0x90] ss:$8 sps:$4 sm:$0xff]  }
 0x1ad   :  { %v4847_v50 = vld [vmem:[#allocation8 + $0x100] ss:$8 sps:$4 sm:$0xff]  }
 0x1af   :  { %2731 = vmatpush1.bf16.msra.mxu0 %v4460_v56  ;;  %2854 = vmatpush1.bf16.msra.mxu1 %v4462_v58  ;;  %v4853_v56 = vld [vmem:[#allocation8 + $0x1a0] ss:$8 sps:$4 sm:$0xff]  }
 0x1b0   :  { %2732 = vmatprep.subr.bf16.mxu0 %v4469_v59  ;;  %2855 = vmatprep.subr.bf16.mxu1 %v4471_v60  ;;  %v4854_v58 = vld [vmem:[#allocation8 + $0x20] ss:$8 sps:$4 sm:$0xff]   ;;  %v4856_v60 = vld [vmem:[#allocation8 + $0xb0] ss:$8 sps:$4 sm:$0xff]  }
 0x1b1   :  { %v4855_v59 = vld [vmem:[#allocation8 + $0x120] ss:$8 sps:$4 sm:$0xff]  }
 0x1b3   :  { %2733 = vmatpush1.bf16.msra.mxu0 %v4468_v1  ;;  %2856 = vmatpush1.bf16.msra.mxu1 %v4470_v2  ;;  %v4862_v1 = vld [vmem:[#allocation8 + $0x40] ss:$8 sps:$4 sm:$0xff]  }
 0x1b4   :  { %2734 = vmatprep.subr.bf16.mxu0 %v4477_v12  ;;  %2857 = vmatprep.subr.bf16.mxu1 %v4479_v57  ;;  %v4863_v2 = vld [vmem:[#allocation8 + $0x140] ss:$8 sps:$4 sm:$0xff]   ;;  %v4864_v12 = vld [vmem:[#allocation8 + $0xd0] ss:$8 sps:$4 sm:$0xff]  }
 0x1b5   :  { %v4865_v57 = vld [vmem:[#allocation8 + $0x1d0] ss:$8 sps:$4 sm:$0xff]  }
 0x1b7   :  { %2735 = vmatpush1.bf16.msra.mxu0 %v4476_v25  ;;  %2858 = vmatpush1.bf16.msra.mxu1 %v4478_v7  ;;  %v4869_v25 = vld [vmem:[#allocation8 + $0x1e0] ss:$8 sps:$4 sm:$0xff]  }
 0x1b8   :  { %2736 = vmatprep.subr.bf16.mxu0 %v4485_v8  ;;  %2859 = vmatprep.subr.bf16.mxu1 %v4487_v9 }
 0x1bb   :  { %2737 = vmatpush1.bf16.msra.mxu0 %v4484_v14  ;;  %2860 = vmatpush1.bf16.msra.mxu1 %v4486_v15 }
 0x1bc   :  { %2738 = vmatprep.subr.bf16.mxu0 %v4493_v34  ;;  %2861 = vmatprep.subr.bf16.mxu1 %v4495_v16  ;;  %v4871_v34 = vld [vmem:[#allocation8 + $0x160] ss:$8 sps:$4 sm:$0xff]   ;;  %v4872_v16 = vld [vmem:[#allocation8 + $0xf0] ss:$8 sps:$4 sm:$0xff]  }
 0x1bf   :  { %2739 = vmatpush1.bf16.msra.mxu0 %v4492_v21  ;;  %2862 = vmatpush1.bf16.msra.mxu1 %v4494_v22  ;;  %v4876_v21 = vld [vmem:[#allocation8 + $0x280] ss:$8 sps:$4 sm:$0xff]  }
 0x1c0   :  { %2740 = vmatprep.subr.bf16.mxu0 %v4501_v24  ;;  %2863 = vmatprep.subr.bf16.mxu1 %v4503_v26  ;;  %v4877_v22 = vld [vmem:[#allocation8 + $0x380] ss:$8 sps:$4 sm:$0xff]  }
 0x1c1   :  { %v4878_v24 = vld [vmem:[#allocation8 + $0x200] ss:$8 sps:$4 sm:$0xff]  }
 0x1c3   :  { %2741 = vmatpush1.bf16.msra.mxu0 %v4500_v31  ;;  %2864 = vmatpush1.bf16.msra.mxu1 %v4502_v32  ;;  %v4882_v31 = vld [vmem:[#allocation8 + $0x210] ss:$8 sps:$4 sm:$0xff]  }
 0x1c4   :  { %2742 = vmatprep.subr.bf16.mxu0 %v4509_v33  ;;  %2865 = vmatprep.subr.bf16.mxu1 %v4511_v35  ;;  %v4883_v32 = vld [vmem:[#allocation8 + $0x310] ss:$8 sps:$4 sm:$0xff]   ;;  %v4884_v33 = vld [vmem:[#allocation8 + $0x2a0] ss:$8 sps:$4 sm:$0xff]  }
 0x1c5   :  { %v4885_v35 = vld [vmem:[#allocation8 + $0x3a0] ss:$8 sps:$4 sm:$0xff]  }
 0x1c7   :  { %2743 = vmatpush1.bf16.msra.mxu0 %v4508_v41  ;;  %2866 = vmatpush1.bf16.msra.mxu1 %v4510_v42  ;;  %v4890_v41 = vld [vmem:[#allocation8 + $0x230] ss:$8 sps:$4 sm:$0xff]  }
 0x1c8   :  { %2744 = vmatprep.subr.bf16.mxu0 %v4517_v43  ;;  %2867 = vmatprep.subr.bf16.mxu1 %v4519_v44  ;;  %v4891_v42 = vld [vmem:[#allocation8 + $0x330] ss:$8 sps:$4 sm:$0xff]   ;;  %v4892_v43 = vld [vmem:[#allocation8 + $0x2c0] ss:$8 sps:$4 sm:$0xff]  }
 0x1c9   :  { %v4893_v44 = vld [vmem:[#allocation8 + $0x3c0] ss:$8 sps:$4 sm:$0xff]  }
 0x1cb   :  { %2745 = vmatpush1.bf16.msra.mxu0 %v4516_v45  ;;  %2868 = vmatpush1.bf16.msra.mxu1 %v4518_v46  ;;  %v4894_v45 = vld [vmem:[#allocation8 + $0x240] ss:$8 sps:$4 sm:$0xff]  }
 0x1cc   :  { %4632 = vmatprep.subr.bf16.mxu0 %v4844_v47  ;;  %4654 = vmatprep.subr.bf16.mxu1 %v4845_v48  ;;  %v4895_v46 = vld [vmem:[#allocation8 + $0x340] ss:$8 sps:$4 sm:$0xff]   ;;  %v4896_v47 = vld [vmem:[#allocation8 + $0x2d0] ss:$8 sps:$4 sm:$0xff]  }
 0x1cd   :  { %v4897_v48 = vld [vmem:[#allocation8 + $0x3d0] ss:$8 sps:$4 sm:$0xff]  }
 0x1ce   :  { %2747 = vmatmul.mubr.bf16.vlgmr.msra.gmra.mrb[4].mxu0 %v5187_v36  ;;  %2870 = vmatmul.mubr.bf16.vlgmr.msra.gmra.mrb[4].mxu1 %v5187_v36  ;;  %v4859_v36 = vld [vmem:[#allocation8 + $0x130] ss:$8 sps:$4 sm:$0xff]  }
 0x1cf   :  { %4633 = vmatpush3.bf16.msra.mxu0 %v4846_v49  ;;  %4655 = vmatpush3.bf16.msra.mxu1 %v4847_v50  ;;  %v4898_v49 = vld [vmem:[#allocation8 + $0x250] ss:$8 sps:$4 sm:$0xff]  }
 0x1d0   :  { %4634 = vmatprep.subr.bf16.mxu0 %v4848_v51  ;;  %4656 = vmatprep.subr.bf16.mxu1 %v4849_v52  ;;  %v4899_v50 = vld [vmem:[#allocation8 + $0x350] ss:$8 sps:$4 sm:$0xff]   ;;  %v4900_v51 = vld [vmem:[#allocation8 + $0x2e0] ss:$8 sps:$4 sm:$0xff]  }
 0x1d1   :  { %v4901_v52 = vld [vmem:[#allocation8 + $0x3e0] ss:$8 sps:$4 sm:$0xff]  }
 0x1d3   :  { %4635 = vmatpush3.bf16.msra.mxu0 %v4850_v53  ;;  %4657 = vmatpush3.bf16.msra.mxu1 %v4851_v54  ;;  %v4902_v53 = vld [vmem:[#allocation8 + $0x260] ss:$8 sps:$4 sm:$0xff]  }
 0x1d4   :  { %4636 = vmatprep.subr.bf16.mxu0 %v4852_v55  ;;  %4658 = vmatprep.subr.bf16.mxu1 %v4853_v56  ;;  %v4903_v54 = vld [vmem:[#allocation8 + $0x360] ss:$8 sps:$4 sm:$0xff]   ;;  %v4904_v55 = vld [vmem:[#allocation8 + $0x2f0] ss:$8 sps:$4 sm:$0xff]  }
 0x1d5   :  { %v4905_v56 = vld [vmem:[#allocation8 + $0x3f0] ss:$8 sps:$4 sm:$0xff]  }
 0x1d7   :  { %4637 = vmatpush3.bf16.msra.mxu0 %v4854_v58  ;;  %4659 = vmatpush3.bf16.msra.mxu1 %v4855_v59  ;;  %v4906_v58 = vld [vmem:[#allocation8 + $0x270] ss:$8 sps:$4 sm:$0xff]  }
 0x1d8   :  { %4638 = vmatprep.subr.bf16.mxu0 %v4856_v60  ;;  %4660 = vmatprep.subr.bf16.mxu1 %v4857_v61  ;;  %v4907_v59 = vld [vmem:[#allocation8 + $0x370] ss:$8 sps:$4 sm:$0xff]   ;;  %v5090_v60 = vmov 0.0  }
 0x1db   :  { %4639 = vmatpush3.bf16.msra.mxu0 %v4858_v62  ;;  %4661 = vmatpush3.bf16.msra.mxu1 %v4859_v36 }
 0x1dc   :  { %4640 = vmatprep.subr.bf16.mxu0 %v4860_v63  ;;  %4662 = vmatprep.subr.bf16.mxu1 %v4861_v0 }
 0x1df   :  { %4641 = vmatpush3.bf16.msra.mxu0 %v4862_v1  ;;  %4663 = vmatpush3.bf16.msra.mxu1 %v4863_v2  ;;  %v4908_v2 = vld [vmem:[#allocation8 + $0x410] ss:$8 sps:$4 sm:$0xff]  }
 0x1e0   :  { %4642 = vmatprep.subr.bf16.mxu0 %v4864_v12  ;;  %4664 = vmatprep.subr.bf16.mxu1 %v4865_v57 }
 0x1e1   :  { %v2502_v6 = vpop.f32.mrb[0].mxu0  ;;  %v2625_v7 = vpop.f32.mrb[0].mxu1 }
 0x1e2   :  { %v2504_v8 = vpop.f32.mrb[1].mxu0  ;;  %v2627_v10 = vpop.f32.mrb[1].mxu1  ;;  %v2878_v26 = vpack.c.bf16 %v2502_v6, %v2502_v6  ;;  %v2880_v29 = vpack.c.bf16 %v2625_v7, %v2625_v7  ;;  %v4910_v7 = vld [vmem:[#allocation8 + $0x430] ss:$8 sps:$4 sm:$0xff]  }
 0x1e3   :  { %v2879_v9 = vpack.c.bf16 %v2504_v8, %v2504_v8  ;;  %v2506_v23 = vpop.f32.mrb[2].mxu0  ;;  %4643 = vmatpush3.bf16.msra.mxu0 %v4866_v3  ;;  %v2881_v13 = vpack.c.bf16 %v2627_v10, %v2627_v10  ;;  %v2629_v14 = vpop.f32.mrb[2].mxu1  ;;  %4665 = vmatpush3.bf16.msra.mxu1 %v4867_v4  ;;  %v4911_v8 = vld [vmem:[#allocation8 + $0x440] ss:$8 sps:$4 sm:$0xff]   ;;  %v3016_v10 = vlaneseq }
 0x1e4   :  { %v2507_v15 = vpop.f32.mrb[3].mxu0  ;;  %4644 = vmatprep.subr.bf16.mxu0 %v4868_v5  ;;  %v2630_v17 = vpop.f32.mrb[3].mxu1  ;;  %4666 = vmatprep.subr.bf16.mxu1 %v4869_v25  ;;  %v4909_v25 = vld [vmem:[#allocation8 + $0x420] ss:$8 sps:$4 sm:$0xff]  }
 0x1e5   :  { %3436 = vmatprep.mubr.bf16.mxu0 %v2879_v9  ;;  %3476 = vmatprep.mubr.bf16.mxu1 %v2881_v13  ;;  %v4912_v9 = vld [vmem:[#allocation8 + $0x450] ss:$8 sps:$4 sm:$0xff]   ;;  %v3017_v23 = vshrl.u32 %v3016_v10, 7 }
 0x1e7   :  { %4645 = vmatpush3.bf16.msra.mxu0 %v4870_v11  ;;  %4667 = vmatpush3.bf16.msra.mxu1 %v4871_v34  ;;  %v3014_v11 = vld [vmem:[#allocation8 + $0x400] sm:$0x1]  ;;  %v5210_v14 = vsub.s32 0, %v3017_v23 }
 0x1e8   :  { %4646 = vmatprep.subr.bf16.mxu0 %v4872_v16  ;;  %4668 = vmatprep.subr.bf16.mxu1 %v4873_v18  ;;  %v3015_v13 = vunpack.c.l.bf16 %v3014_v11 }
 0x1ea   :  { %v3019_v34 = vrot.slane %v3015_v13, %v5210_v14 }
 0x1eb   :  { %4647 = vmatpush3.bf16.msra.mxu0 %v4874_v19  ;;  %4669 = vmatpush3.bf16.msra.mxu1 %v4875_v20 }
 0x1ec   :  { %4676 = vmatprep.subr.bf16.mxu0 %v4876_v21  ;;  %4698 = vmatprep.subr.bf16.mxu1 %v4877_v22 }
 0x1ee   :  { %3437 = vmatmul.mubr.bf16.vlgmr.msra.gmra.mrb[8].mxu0 %v2878_v26  ;;  %3477 = vmatmul.mubr.bf16.vlgmr.msra.gmra.mrb[8].mxu1 %v2880_v29  ;;  %v4913_v29 = vld [vmem:[#allocation8 + $0x460] ss:$8 sps:$4 sm:$0xff]  }
 0x1ef   :  { %4677 = vmatpush3.bf16.msra.mxu0 %v4878_v24  ;;  %4699 = vmatpush3.bf16.msra.mxu1 %v4879_v27 }
 0x1f0   :  { %4678 = vmatprep.subr.bf16.mxu0 %v4880_v28  ;;  %4700 = vmatprep.subr.bf16.mxu1 %v4881_v30  ;;  %v4914_v30 = vld [vmem:[#allocation8 + $0x470] ss:$8 sps:$4 sm:$0xff]  }
 0x1f3   :  { %4679 = vmatpush3.bf16.msra.mxu0 %v4882_v31  ;;  %4701 = vmatpush3.bf16.msra.mxu1 %v4883_v32  ;;  %v4915_v31 = vld [vmem:[#allocation8 + $0x480] ss:$8 sps:$4 sm:$0xff]  }
 0x1f4   :  { %4680 = vmatprep.subr.bf16.mxu0 %v4884_v33  ;;  %4702 = vmatprep.subr.bf16.mxu1 %v4885_v35  ;;  %v4916_v32 = vld [vmem:[#allocation8 + $0x4a0] ss:$8 sps:$4 sm:$0xff]   ;;  %v4917_v33 = vld [vmem:[#allocation8 + $0x4b0] ss:$8 sps:$4 sm:$0xff]  }
 0x1f5   :  { %v4918_v35 = vld [vmem:[#allocation8 + $0x4c0] ss:$8 sps:$4 sm:$0xff]  }
 0x1f7   :  { %4681 = vmatpush3.bf16.msra.mxu0 %v4886_v37  ;;  %4703 = vmatpush3.bf16.msra.mxu1 %v4887_v38  ;;  %v4919_v37 = vld [vmem:[#allocation8 + $0x4d0] ss:$8 sps:$4 sm:$0xff]   ;;  %v4920_v38 = vld [vmem:[#allocation8 + $0x4e0] ss:$8 sps:$4 sm:$0xff]  }
 0x1f8   :  { %4682 = vmatprep.subr.bf16.mxu0 %v4888_v39  ;;  %4704 = vmatprep.subr.bf16.mxu1 %v4889_v40  ;;  %v4921_v39 = vld [vmem:[#allocation8 + $0x4f0] ss:$8 sps:$4 sm:$0xff]  }
 0x1fb   :  { %4683 = vmatpush3.bf16.msra.mxu0 %v4890_v41  ;;  %4705 = vmatpush3.bf16.msra.mxu1 %v4891_v42 }
 0x1fc   :  { %4684 = vmatprep.subr.bf16.mxu0 %v4892_v43  ;;  %4706 = vmatprep.subr.bf16.mxu1 %v4893_v44 }
 0x1ff   :  { %4685 = vmatpush3.bf16.msra.mxu0 %v4894_v45  ;;  %4707 = vmatpush3.bf16.msra.mxu1 %v4895_v46 }
 0x200   :  { %4686 = vmatprep.subr.bf16.mxu0 %v4896_v47  ;;  %4708 = vmatprep.subr.bf16.mxu1 %v4897_v48 }
 0x203   :  { %4687 = vmatpush3.bf16.msra.mxu0 %v4898_v49  ;;  %4709 = vmatpush3.bf16.msra.mxu1 %v4899_v50 }
 0x204   :  { %4688 = vmatprep.subr.bf16.mxu0 %v4900_v51  ;;  %4710 = vmatprep.subr.bf16.mxu1 %v4901_v52  ;;  %v3565_v52 = vld [vmem:[#allocation5] sm:$0xff] }
 0x207   :  { %4689 = vmatpush3.bf16.msra.mxu0 %v4902_v53  ;;  %4711 = vmatpush3.bf16.msra.mxu1 %v4903_v54 }
 0x208   :  { %4690 = vmatprep.subr.bf16.mxu0 %v4904_v55  ;;  %4712 = vmatprep.subr.bf16.mxu1 %v4905_v56  ;;  %v4922_v56 = vld [vmem:[#allocation8 + $0x500] ss:$8 sps:$4 sm:$0xff]  }
 0x20b   :  { %4691 = vmatpush3.bf16.msra.mxu0 %v4906_v58  ;;  %4713 = vmatpush3.bf16.msra.mxu1 %v4907_v59  ;;  %v4923_v58 = vld [vmem:[#allocation8 + $0x510] ss:$8 sps:$4 sm:$0xff]  }
 0x20c   :  { %4760 = vmatprep.subr.bf16.mxu0 %v5090_v60  ;;  %4780 = vmatprep.subr.bf16.mxu1 %v5090_v60  ;;  %v4924_v59 = vld [vmem:[#allocation8 + $0x530] ss:$8 sps:$4 sm:$0xff]  }
 0x2a1   :  { %v2748_v61 = vpop.f32.mrb[4].mxu0  ;;  %v2871_v62 = vpop.f32.mrb[4].mxu1 }
 0x2a2   :  { %v2750_v36 = vpop.f32.mrb[5].mxu0  ;;  %v2873_v0 = vpop.f32.mrb[5].mxu1  ;;  %v2882_v12 = vpack.c.bf16 %v2748_v61, %v2748_v61  ;;  %v2884_v5 = vpack.c.bf16 %v2871_v62, %v2871_v62  ;;  %v4926_v61 = vld [vmem:[#allocation8 + $0x534] ss:$8 sps:$4 sm:$0xff]   ;;  %v4929_v62 = vld [vmem:[#allocation8 + $0x544] ss:$8 sps:$4 sm:$0xff]  }
 0x2a3   :  { %v2883_v63 = vpack.c.bf16 %v2750_v36, %v2750_v36  ;;  %v2752_v1 = vpop.f32.mrb[6].mxu0  ;;  %v2885_v57 = vpack.c.bf16 %v2873_v0, %v2873_v0  ;;  %v2875_v3 = vpop.f32.mrb[6].mxu1  ;;  %v4927_v36 = vld [vmem:[#allocation8 + $0x540] ss:$8 sps:$4 sm:$0xff]   ;;  %v4930_v0 = vld [vmem:[#allocation8 + $0x550] ss:$8 sps:$4 sm:$0xff]  }
 0x2a4   :  { %v2753_v4 = vpop.f32.mrb[7].mxu0  ;;  %v2876_v6 = vpop.f32.mrb[7].mxu1  ;;  %v4935_v1 = vld [vmem:[#allocation8 + $0x564] ss:$8 sps:$4 sm:$0xff]   ;;  %v4939_v3 = vld [vmem:[#allocation8 + $0x580] ss:$8 sps:$4 sm:$0xff]  }
 0x2a5   :  { %3516 = vmatprep.mubr.bf16.mxu0 %v2883_v63  ;;  %3556 = vmatprep.mubr.bf16.mxu1 %v2885_v57  ;;  %v4932_v63 = vld [vmem:[#allocation8 + $0x554] ss:$8 sps:$4 sm:$0xff]   ;;  %v4941_v57 = vld [vmem:[#allocation8 + $0x584] ss:$8 sps:$4 sm:$0xff]   ;;  %v3584_v6 = vld [vmem:[#allocation8 + $0x490] sm:$0x1] }
 0x2a6   :  { %3517 = vmatmul.mubr.bf16.vlgmr.msra.gmra.mrb[12].mxu0 %v2882_v12  ;;  %3557 = vmatmul.mubr.bf16.vlgmr.msra.gmra.mrb[12].mxu1 %v2884_v5  ;;  %v4938_v12 = vld [vmem:[#allocation8 + $0x574] ss:$8 sps:$4 sm:$0xff]   ;;  %v4942_v5 = vld [vmem:[#allocation8 + $0x590] ss:$8 sps:$4 sm:$0xff]  }
 0x2a7   :  { %4761 = vmatpush3.bf16.msra.mxu0 %v4908_v2  ;;  %4776 = vmatprep.mubr.msk.bf16.mxu0 %vm5091_vm0, %v5090_v60  ;;  %v4933_v2 = vld [vmem:[#allocation8 + $0x560] ss:$8 sps:$4 sm:$0xff]   ;;  %v4944_v4 = vld [vmem:[#allocation8 + $0x594] ss:$8 sps:$4 sm:$0xff]  }
 0x2a8   :  { %4762 = vmatprep.subr.bf16.mxu0 %v5090_v60  ;;  %4796 = vmatprep.mubr.msk.bf16.mxu1 %vm5091_vm0, %v5090_v60 }
 0x2a9   :  { %4781 = vmatpush3.bf16.msra.mxu1 %v4916_v32  ;;  %v3696_v32 = vld [vmem:[#allocation8 + $0x520] sm:$0x1] }
 0x2aa   :  { %4782 = vmatprep.subr.bf16.mxu1 %v5090_v60 }
 0x2ab   :  { %4763 = vmatpush3.bf16.msra.mxu0 %v4909_v25  ;;  %v3585_v25 = vunpack.c.l.bf16 %v3584_v6 }
 0x2ac   :  { %4764 = vmatprep.subr.bf16.mxu0 %v5090_v60 }
 0x2ad   :  { %4783 = vmatpush3.bf16.msra.mxu1 %v4917_v33  ;;  %v3697_v33 = vunpack.c.l.bf16 %v3696_v32 }
 0x2ae   :  { %4784 = vmatprep.subr.bf16.mxu1 %v5090_v60 }
 0x2af   :  { %4765 = vmatpush3.bf16.msra.mxu0 %v4910_v7  ;;  %v3589_v7 = vrot.slane %v3585_v25, %v5210_v14 }
 0x2b0   :  { %4766 = vmatprep.subr.bf16.mxu0 %v5090_v60 }
 0x2b1   :  { %4785 = vmatpush3.bf16.msra.mxu1 %v4918_v35  ;;  %v3701_v35 = vrot.slane %v3697_v33, %v5210_v14 }
 0x2b2   :  { %4786 = vmatprep.subr.bf16.mxu1 %v5090_v60 }
 0x2b3   :  { %4767 = vmatpush3.bf16.msra.mxu0 %v4911_v8 }
 0x2b4   :  { %4768 = vmatprep.subr.bf16.mxu0 %v5090_v60 }
 0x2b5   :  { %4787 = vmatpush3.bf16.msra.mxu1 %v4919_v37 }
 0x2b6   :  { %4788 = vmatprep.subr.bf16.mxu1 %v5090_v60 }
 0x2b7   :  { %4769 = vmatpush3.bf16.msra.mxu0 %v4912_v9 }
 0x2b8   :  { %4770 = vmatprep.subr.bf16.mxu0 %v5090_v60 }
 0x2b9   :  { %4789 = vmatpush3.bf16.msra.mxu1 %v4920_v38 }
 0x2ba   :  { %4790 = vmatprep.subr.bf16.mxu1 %v5090_v60 }
 0x2bb   :  { %4771 = vmatpush3.bf16.msra.mxu0 %v4913_v29  ;;  %v4957_v29 = vld [vmem:[#allocation8 + $0x600] ss:$8 sps:$4 sm:$0xff]  }
 0x2bc   :  { %4772 = vmatprep.subr.bf16.mxu0 %v5090_v60 }
 0x2bd   :  { %4791 = vmatpush3.bf16.msra.mxu1 %v4921_v39 }
 0x2be   :  { %4792 = vmatprep.subr.bf16.mxu1 %v5090_v60 }
 0x2bf   :  { %4773 = vmatpush3.bf16.msra.mxu0 %v4914_v30  ;;  %v4958_v30 = vld [vmem:[#allocation8 + $0x690] ss:$8 sps:$4 sm:$0xff]  }
 0x2c0   :  { %4774 = vmatprep.subr.bf16.mxu0 %v5090_v60 }
 0x2c1   :  { %v4648_v15 = vpop.f32.mrb[8].mxu0  ;;  %v4670_v16 = vpop.f32.mrb[8].mxu1  ;;  %4793 = vmatpush3.bf16.msra.mxu1 %v4922_v56 }
 0x2c2   :  { %v4649_v17 = vpop.f32.mrb[9].mxu0  ;;  %v4671_v19 = vpop.f32.mrb[9].mxu1  ;;  %4794 = vmatprep.subr.bf16.mxu1 %v5090_v60  ;;  %v4936_v60 = vld [vmem:[#allocation8 + $0x570] ss:$8 sps:$4 sm:$0xff]  }
 0x2c3   :  { %v4650_v18 = vadd.f32 %v4649_v17, %v4648_v15  ;;  %v4651_v20 = vpop.f32.mrb[10].mxu0  ;;  %v4672_v21 = vadd.f32 %v4671_v19, %v4670_v16  ;;  %v4673_v22 = vpop.f32.mrb[10].mxu1  ;;  %4775 = vmatpush3.bf16.msra.mxu0 %v4915_v31  ;;  %v4945_v16 = vld [vmem:[#allocation8 + $0x5a0] ss:$8 sps:$4 sm:$0xff]   ;;  %v5092_v17 = vmov 0  }
 0x2c4   :  { %v4652_v24 = vpop.f32.mrb[11].mxu0  ;;  %v4674_v27 = vpop.f32.mrb[11].mxu1  ;;  %3899 = vmatprep.subr.bf16.mxu0 %v4926_v61  ;;  %v4949_v19 = vld [vmem:[#allocation8 + $0x5c0] ss:$8 sps:$4 sm:$0xff]   ;;  %v4950_v20 = vld [vmem:[#allocation8 + $0x650] ss:$8 sps:$4 sm:$0xff]  }
 0x2c5   :  { %v3439_v26 = vadd.f32 %v4650_v18, %v3019_v34  ;;  %4795 = vmatpush3.bf16.msra.mxu1 %v4923_v58  ;;  %v4947_v34 = vld [vmem:[#allocation8 + $0x5a4] ss:$8 sps:$4 sm:$0xff]   ;;  %v4948_v18 = vld [vmem:[#allocation8 + $0x640] ss:$8 sps:$4 sm:$0xff]   ;;  %v4955_v27 = vld [vmem:[#allocation8 + $0x5f0] ss:$8 sps:$4 sm:$0xff]  }
 0x2c6   :  { %4738 = vmatprep.subr.bf16.mxu1 %v4948_v18  ;;  %v4952_v22 = vld [vmem:[#allocation8 + $0x660] ss:$8 sps:$4 sm:$0xff]   ;;  %v4959_v31 = vld [vmem:[#allocation8 + $0x610] ss:$8 sps:$4 sm:$0xff]  }
 0x2c7   :  { %v3479_v28 = vadd.f32 %v4672_v21, %v3439_v26  ;;  %v4951_v21 = vld [vmem:[#allocation8 + $0x5d0] ss:$8 sps:$4 sm:$0xff]   ;;  %v4953_v24 = vld [vmem:[#allocation8 + $0x5e0] ss:$8 sps:$4 sm:$0xff]  }
 0x2c8   :  { %v4954_v26 = vld [vmem:[#allocation8 + $0x670] ss:$8 sps:$4 sm:$0xff]  }
 0x379   :  { %v4692_v40 = vpop.f32.mrb[12].mxu0  ;;  %v4714_v41 = vpop.f32.mrb[12].mxu1 }
 0x37a   :  { %v4693_v42 = vpop.f32.mrb[13].mxu0  ;;  %v4715_v44 = vpop.f32.mrb[13].mxu1 }
 0x37b   :  { %v4694_v43 = vadd.f32 %v4693_v42, %v4692_v40  ;;  %v4695_v45 = vpop.f32.mrb[14].mxu0  ;;  %v4716_v46 = vadd.f32 %v4715_v44, %v4714_v41  ;;  %v4717_v47 = vpop.f32.mrb[14].mxu1  ;;  %v4960_v44 = vld [vmem:[#allocation8 + $0x6a0] ss:$8 sps:$4 sm:$0xff]  }
 0x37c   :  { %v4696_v48 = vpop.f32.mrb[15].mxu0  ;;  %v4718_v50 = vpop.f32.mrb[15].mxu1  ;;  %v4961_v45 = vld [vmem:[#allocation8 + $0x620] ss:$8 sps:$4 sm:$0xff]   ;;  %v4963_v47 = vld [vmem:[#allocation8 + $0x630] ss:$8 sps:$4 sm:$0xff]  }
 0x37d   :  { %v3519_v49 = vadd.f32 %v4694_v43, %v3479_v28  ;;  %v4956_v28 = vld [vmem:[#allocation8 + $0x680] ss:$8 sps:$4 sm:$0xff]   ;;  %v3808_v48 = vld [vmem:[#allocation8 + $0x5b0] sm:$0x11] }
 0x37e   :  { %v3810_v50 = vunpack.c.h.bf16 %v3808_v48 }
 0x37f   :  { %v3559_v51 = vadd.f32 %v4716_v46, %v3519_v49  ;;  %v4962_v46 = vld [vmem:[#allocation8 + $0x6b0] ss:$8 sps:$4 sm:$0xff]   ;;  %v3809_v49 = vunpack.c.l.bf16 %v3808_v48 }
 0x381   :  { %v3564_v53 = vmax.f32 %v3559_v51, 0.0  ;;  %v3814_v51 = vrot.slane %v3809_v49, %v5210_v14 }
 0x383   :  { %v3566_v54 = vadd.f32 %v3565_v52, %v3564_v53  ;;  %v3818_v52 = vrot.slane %v3810_v50, %v5210_v14 }
 0x385   :  { %v3567_v55 = vpack.c.bf16 %v3566_v54, %v3566_v54 }
 0x387   :  { %4777 = vmatmul.mubr.bf16.vlgmr.msra.gmra.mrb[16].mxu0 %v3567_v55 }
 0x388   :  { %3900 = vmatpush1.bf16.msra.mxu0 %v4924_v59  ;;  %3931 = vmatprep.mubr.bf16.mxu0 %v5092_v17 }
 0x389   :  { %3901 = vmatprep.subr.bf16.mxu0 %v4929_v62 }
 0x38c   :  { %3902 = vmatpush1.bf16.msra.mxu0 %v4927_v36 }
 0x38d   :  { %3903 = vmatprep.subr.bf16.mxu0 %v4932_v63 }
 0x390   :  { %3904 = vmatpush1.bf16.msra.mxu0 %v4930_v0  ;;  %v3976_v0 = vld [vmem:[#allocation8 + $0x6c0] sm:$0x1] }
 0x391   :  { %3905 = vmatprep.subr.bf16.mxu0 %v4935_v1  ;;  %v3977_v1 = vunpack.c.l.bf16 %v3976_v0 }
 0x394   :  { %3906 = vmatpush1.bf16.msra.mxu0 %v4933_v2 }
 0x395   :  { %3907 = vmatprep.subr.bf16.mxu0 %v4938_v12  ;;  %v3981_v12 = vrot.slane %v3977_v1, %v5210_v14 }
 0x398   :  { %3908 = vmatpush1.bf16.msra.mxu0 %v4936_v60 }
 0x399   :  { %3909 = vmatprep.subr.bf16.mxu0 %v4941_v57 }
 0x39c   :  { %3910 = vmatpush1.bf16.msra.mxu0 %v4939_v3 }
 0x39d   :  { %3911 = vmatprep.subr.bf16.mxu0 %v4944_v4 }
 0x3a0   :  { %3912 = vmatpush1.bf16.msra.mxu0 %v4942_v5 }
 0x3a1   :  { %3913 = vmatprep.subr.bf16.mxu0 %v4947_v34 }
 0x3a4   :  { %3914 = vmatpush1.bf16.msra.mxu0 %v4945_v16 }
 0x45a   :  { %v3672_v8 = vpop.f32.mrb[16].mxu0 }
 0x45b   :  { %v3673_v9 = vadd.f32 %v3672_v8, %v3589_v7  ;;  %v4778_v10 = vpop.f32.mrb[17].mxu0 }
 0x45c   :  { %v3675_v23 = vpop.f32.mrb[18].mxu0 }
 0x45d   :  { %v3678_v11 = vmax.f32 %v3673_v9, 0.0  ;;  %v4779_v13 = vpop.f32.mrb[19].mxu0 }
 0x45f   :  { %v3679_v15 = vpack.c.bf16 %v3678_v11, %v3678_v11 }
 0x461   :  { %4797 = vmatmul.mubr.bf16.vlgmr.msra.gmra.mrb[16].mxu1 %v3679_v15 }
 0x462   :  { %4739 = vmatpush3.bf16.msra.mxu1 %v4949_v19 }
 0x463   :  { %4740 = vmatprep.subr.bf16.mxu1 %v4950_v20 }
 0x466   :  { %4741 = vmatpush3.bf16.msra.mxu1 %v4951_v21 }
 0x467   :  { %4742 = vmatprep.subr.bf16.mxu1 %v4952_v22 }
 0x46a   :  { %4743 = vmatpush3.bf16.msra.mxu1 %v4953_v24 }
 0x46b   :  { %4744 = vmatprep.subr.bf16.mxu1 %v4954_v26 }
 0x46e   :  { %4745 = vmatpush3.bf16.msra.mxu1 %v4955_v27 }
 0x46f   :  { %4746 = vmatprep.subr.bf16.mxu1 %v4956_v28 }
 0x472   :  { %4747 = vmatpush3.bf16.msra.mxu1 %v4957_v29 }
 0x473   :  { %4748 = vmatprep.subr.bf16.mxu1 %v4958_v30 }
 0x476   :  { %4749 = vmatpush3.bf16.msra.mxu1 %v4959_v31 }
 0x477   :  { %4750 = vmatprep.subr.bf16.mxu1 %v4960_v44 }
 0x47a   :  { %4751 = vmatpush3.bf16.msra.mxu1 %v4961_v45 }
 0x47b   :  { %4752 = vmatprep.subr.bf16.mxu1 %v4962_v46 }
 0x47e   :  { %4753 = vmatpush3.bf16.msra.mxu1 %v4963_v47 }
 0x534   :  { %v3784_v37 = vpop.f32.mrb[16].mxu1 }
 0x535   :  { %v3785_v38 = vadd.f32 %v3784_v37, %v3701_v35  ;;  %v4798_v39 = vpop.f32.mrb[17].mxu1 }
 0x536   :  { %v3787_v40 = vpop.f32.mrb[18].mxu1 }
 0x537   :  { %v3790_v41 = vmax.f32 %v3785_v38, 0.0  ;;  %v4799_v42 = vpop.f32.mrb[19].mxu1 }
 0x539   :  { %v3791_v43 = vpack.c.bf16 %v3790_v41, %v3790_v41 }
 0x53b   :  { %3932 = vmatmul.mubr.bf16.vlgmr.msra.gmra.mrb[20].mxu0 %v3791_v43 }
 0x60e   :  { %v3933_v53 = vpop.f32.mrb[20].mxu0 }
 0x60f   :  { %v3934_v54 = vadd.f32 %v3933_v53, %v3814_v51  ;;  %v3935_v55 = vpop.f32.mrb[21].mxu0 }
 0x610   :  { %v3936_v56 = vadd.f32 %v3935_v55, %v3818_v52  ;;  %v3937_v58 = vpop.f32.mrb[22].mxu0 }
 0x611   :  { %v3940_v59 = vmax.f32 %v3934_v54, 0.0  ;;  %v3938_v61 = vpop.f32.mrb[23].mxu0 }
 0x612   :  { %v3941_v62 = vmax.f32 %v3936_v56, 0.0 }
 0x613   :  { %v3942_v63 = vpack.c.bf16 %v3940_v59, %v3940_v59 }
 0x614   :  { %v3943_v36 = vpack.c.bf16 %v3941_v62, %v3941_v62 }
 0x616   :  { %4110 = vmatprep.mubr.bf16.mxu1 %v3943_v36 }
 0x617   :  { %4111 = vmatmul.mubr.bf16.vlgmr.msra.gmra.mrb[20].mxu1 %v3942_v63 }
 0x6ea   :  { %v4754_v2 = vpop.f32.mrb[20].mxu1 }
 0x6eb   :  { %v4755_v60 = vpop.f32.mrb[21].mxu1 }
 0x6ec   :  { %v4756_v57 = vadd.f32 %v4755_v60, %v4754_v2  ;;  %v4757_v3 = vpop.f32.mrb[22].mxu1 }
 0x6ed   :  { %v4758_v4 = vpop.f32.mrb[23].mxu1 }
 0x6ee   :  { %v4113_v5 = vadd.f32 %v4756_v57, %v3981_v12 }
 0x6f0   :  { %4118 = vst [vmem:[#allocation10] sm:$0xff] %v4113_v5 }
 0x6f1   :  { %5063 = shalt.err (!%p5060_p8)
}
 0x6f2   :  { %s5064_s15 = scalar_lea.hbm %s5245_s4, 128 }
 0x6f3   :  { %p5065_p9 = scmp.ne.s32.totalorder %s5245_s4, %s5064_s15  ;;  %p5068_p10 = scmp.lt.u32.totalorder %s5064_s15, %s5245_s4 }
 0x6f5   :  { %p5070_p11 = pnand %p5068_p10, %p5065_p9 }
 0x6f7   :  { %5073 = shalt.err (!%p5070_p11)
}
 0x6f8   :  { %4128 = dma.vmem_to_hbm [thread:$0]  %s4126_s11, 128, %s5245_s4, [#allocation4]  }
 0x6f9   :  { %5080 = dma.done.wait [#allocation4], 128  }
 0x6fa   :  { %5081 = vsyncadd [#allocation4], 4294967168 }
 0x6fb   :  { %4132 = vsyncpa [#allocation3], 1 }
 0x6fc   :  { %4133 = vsyncpa [#allocation6], 1 }
 0x6fd   :  { %4134 = vsyncpa [#allocation9], 1 }
 0x6fe   :  { %4135 = vsyncpa [#allocation4], 1 }

</bundles_post_ra>
